<compile_context>
chip_gen: v6e
topology: v6e:2x2x1
jax: 0.10.0
libtpu: 0.0.40
codegen_flags: <defaults>
</compile_context>

<pallas_src>
import functools
import math

import jax
import jax.numpy as jnp
from jax.experimental import pallas as pl
from jax.experimental.pallas import tpu as pltpu


_MASK_VALUE = -1e30                       # large finite negative (avoids inf arithmetic)
_LN_EPS = 1e-5                            # torch nn.LayerNorm default


def _tpu_vmem_capacity_bytes():
    try:
        return int(pltpu.get_tpu_info().vmem_capacity_bytes)
    except Exception:
        return 64 * 1024 * 1024           # conservative fallback (v7x per-core VMEM)


_VMEM_CAPACITY = _tpu_vmem_capacity_bytes()
# Generation-aware scoped-VMEM request: ~96 MiB on v5e/v6e (128 MiB physical),
# ~48 MiB on v7x (64 MiB physical).
_VMEM_LIMIT_BYTES = min(100 * 1024 * 1024, (_VMEM_CAPACITY * 3) // 4)
# Per-block cap: big tiles amortize the ~0.35us per-grid-step overhead.
_BLOCK_BYTES_CAP = max(4 * 1024 * 1024, _VMEM_LIMIT_BYTES // 8)


def _compiler_params(dimension_semantics):
    return pltpu.CompilerParams(
        dimension_semantics=tuple(dimension_semantics),
        vmem_limit_bytes=_VMEM_LIMIT_BYTES,
    )


def _row_tile(n_rows, per_row_bytes, resident_bytes=0, row_multiple=8):
    """Rows per block.

    The tile must divide n_rows and be a multiple of `row_multiple` (sublane tile) —
    otherwise we fall back to the full extent, which is always legal for BlockSpecs.
    Sizing accounts for the double-buffered row blocks AND the resident weight blocks;
    tiles that are multiples of 128 are preferred (keeps the MXU M dim fed).
    """
    budget = _VMEM_LIMIT_BYTES - 2 * resident_bytes
    cap = min(_BLOCK_BYTES_CAP, max(budget // 4, 0))
    cap = max(cap, row_multiple * per_row_bytes)      # never force below one sublane tile
    best, best128 = 0, 0
    for t in range(row_multiple, n_rows + 1, row_multiple):
        if n_rows % t == 0 and t * per_row_bytes <= cap:
            best = t
            if t % 128 == 0:
                best128 = t
    if best128:
        return best128
    if best:
        return best
    return n_rows                                      # full-extent block (always legal)


def _ff_chunk(ff):
    """FF-hidden chunk size: must be a multiple of 128 (lane tile) or the full FF."""
    if ff % 128 != 0 or ff <= 512:
        return ff
    best = 128
    for c in range(128, 513, 128):
        if ff % c == 0:
            best = c
    return best


# ----------------------------------------------------------------------------
# Positional encoding table (same values as the PyTorch buffer, stored 2-D).
# ----------------------------------------------------------------------------
def make_positional_encoding_table(max_len, d_model, dtype=jnp.float32):
    position = jnp.arange(max_len, dtype=jnp.float32)[:, None]
    div_term = jnp.exp(
        jnp.arange(0, d_model, 2, dtype=jnp.float32) * (-math.log(10000.0) / d_model)
    )
    pe = jnp.zeros((max_len, d_model), dtype=jnp.float32)
    pe = pe.at[:, 0::2].set(jnp.sin(position * div_term))
    pe = pe.at[:, 1::2].set(jnp.cos(position * div_term))
    return pe.astype(dtype)                            # (max_len, d_model)


# ----------------------------------------------------------------------------
# Kernel bodies
# ----------------------------------------------------------------------------
def _embed_pe_qkv_kernel(seed_ref, x_ref, pe_ref, wt_ref, b_ref, xpe_ref, qkv_ref,
                         *, p, training):
    """(emb + pe) [+ dropout] -> writes x_pe and the fused qkv projection."""
    x = x_ref[...].astype(jnp.float32) + pe_ref[...].astype(jnp.float32)
    if training and p > 0.0:
        # Mix the grid position into the seed so every tile draws an independent mask.
        pltpu.prng_seed(
            seed_ref[0]
            + pl.program_id(0) * pl.num_programs(1)
            + pl.program_id(1)
        )
        bits = pltpu.bitcast(pltpu.prng_random_bits(x.shape), jnp.uint32)
        thresh = jnp.uint32(min(int(round(p * float(2 ** 32))), 2 ** 32 - 1))
        x = jnp.where(bits >= thresh, x * (1.0 / (1.0 - p)), jnp.zeros_like(x))
    xpe_ref[...] = x.astype(xpe_ref.dtype)
    # MXU operands in the stored weight dtype (bf16-ready); accumulate in f32.
    qkv = jnp.dot(x.astype(wt_ref.dtype), wt_ref[...], preferred_element_type=jnp.float32)
    qkv_ref[...] = (qkv + b_ref[...].astype(jnp.float32)).astype(qkv_ref.dtype)


def _causal_mha_kernel(qkv_ref, o_ref, *, num_heads, d_model, scale):
    """One batch per grid step; heads are read straight out of the (S, 3D) qkv block
    and the merged (S, D) context is stored lane-dense (no head split/merge in XLA)."""
    qkv = qkv_ref[...]
    S = qkv.shape[0]
    D = d_model
    hd = D // num_heads
    row = jax.lax.broadcasted_iota(jnp.int32, (S, S), 0)
    col = jax.lax.broadcasted_iota(jnp.int32, (S, S), 1)
    causal = col <= row                                # causal mask built in-kernel
    ctx = []
    for h in range(num_heads):                         # static loop, H is small
        q = qkv[:, h * hd:(h + 1) * hd]
        k = qkv[:, D + h * hd:D + (h + 1) * hd]
        v = qkv[:, 2 * D + h * hd:2 * D + (h + 1) * hd]
        s = jnp.einsum("qd,kd->qk", q, k, preferred_element_type=jnp.float32) * scale
        s = jnp.where(causal, s, _MASK_VALUE)
        m = jnp.max(s, axis=-1, keepdims=True)
        p = jnp.exp(s - m)
        p = p * pl.reciprocal(jnp.sum(p, axis=-1, keepdims=True), approx=True)
        ctx.append(jnp.dot(p.astype(v.dtype), v, preferred_element_type=jnp.float32))
    o_ref[...] = jnp.concatenate(ctx, axis=-1).astype(o_ref.dtype)


def _linear_residual_ln_kernel(x_ref, wt_ref, b_ref, res_ref, g_ref, beta_ref, o_ref, *, eps):
    """LayerNorm(residual + x @ W^T + b) fused."""
    y = jnp.dot(x_ref[...].astype(wt_ref.dtype), wt_ref[...],
                preferred_element_type=jnp.float32)
    y = y + b_ref[...].astype(jnp.float32) + res_ref[...].astype(jnp.float32)
    mu = jnp.mean(y, axis=-1, keepdims=True)
    var = jnp.mean(jnp.square(y - mu), axis=-1, keepdims=True)
    yn = (y - mu) * jax.lax.rsqrt(var + eps)
    o_ref[...] = (yn * g_ref[...].astype(jnp.float32)
                  + beta_ref[...].astype(jnp.float32)).astype(o_ref.dtype)


def _ffn_residual_ln_kernel(x_ref, w1t_ref, b1_ref, w2t_ref, b2_ref, g_ref, beta_ref,
                            o_ref, acc_ref, *, eps):
    """linear1 + ReLU + linear2 + residual + LayerNorm2 with the FF dim chunked over
    grid axis 1 ('arbitrary'); the (N, FF) intermediate never leaves VMEM."""
    c = pl.program_id(1)

    @pl.when(c == 0)
    def _():
        acc_ref[...] = jnp.zeros_like(acc_ref)

    x = x_ref[...]
    h = jnp.dot(x.astype(w1t_ref.dtype), w1t_ref[...], preferred_element_type=jnp.float32)
    h = jnp.maximum(h + b1_ref[...].astype(jnp.float32), 0.0)
    acc_ref[...] += jnp.dot(h.astype(w2t_ref.dtype), w2t_ref[...],
                            preferred_element_type=jnp.float32)

    @pl.when(c == pl.num_programs(1) - 1)
    def _():
        y = acc_ref[...] + b2_ref[...].astype(jnp.float32) + x.astype(jnp.float32)
        mu = jnp.mean(y, axis=-1, keepdims=True)
        var = jnp.mean(jnp.square(y - mu), axis=-1, keepdims=True)
        yn = (y - mu) * jax.lax.rsqrt(var + eps)
        o_ref[...] = (yn * g_ref[...].astype(jnp.float32)
                      + beta_ref[...].astype(jnp.float32)).astype(o_ref.dtype)


def _linear_logsoftmax_kernel(x_ref, wt_ref, b_ref, o_ref):
    """log_softmax(x @ W^T + b, axis=-1) fused."""
    z = jnp.dot(x_ref[...].astype(wt_ref.dtype), wt_ref[...],
                preferred_element_type=jnp.float32)
    z = z + b_ref[...].astype(jnp.float32)
    m = jnp.max(z, axis=-1, keepdims=True)
    lse = jnp.log(jnp.sum(jnp.exp(z - m), axis=-1, keepdims=True)) + m
    o_ref[...] = (z - lse).astype(o_ref.dtype)


# ----------------------------------------------------------------------------
# pallas_call wrappers
# ----------------------------------------------------------------------------
def embed_pe_qkv(x_emb, pe_table, w_in_t, b_in, *, batch, seq_len, p=0.1,
                 training=False, seed=0):
    """Fused (emb + pe) [+ dropout] and qkv projection.

    Returns (x_pe, qkv) with shapes (N, D) and (N, 3D); rows are batch-major."""
    N, D = x_emb.shape
    out3 = w_in_t.shape[1]
    itemsize = max(x_emb.dtype.itemsize, 4)
    row_mult = 8 if x_emb.dtype.itemsize >= 4 else 16
    per_row = (3 * D + out3) * itemsize
    resident = (w_in_t.size + b_in.size) * w_in_t.dtype.itemsize

    if seq_len % row_mult == 0:
        # Tile each batch's S rows; the PE table is sliced via the index_map
        # (no pe[:S] materialization in HBM).
        t = _row_tile(seq_len, per_row, 2 * resident, row_multiple=row_mult)
        sb = seq_len // t
        pe_in = pe_table
        grid = (batch, sb)
        x_idx = lambda b, si, seed_ref: (b * sb + si, 0)
        pe_idx = lambda b, si, seed_ref: (si, 0)
    else:
        # Rare fallback (S not a multiple of the sublane tile): broadcast PE rows once
        # and tile straight over the N = B*S rows (full-extent fallback always legal).
        t = _row_tile(N, per_row, 2 * resident, row_multiple=row_mult)
        pe_in = jnp.tile(pe_table[:seq_len], (batch, 1))
        grid = (1, N // t)
        x_idx = lambda b, si, seed_ref: (si, 0)
        pe_idx = x_idx

    seed_arr = jnp.array([seed], dtype=jnp.int32)
    kernel = functools.partial(_embed_pe_qkv_kernel, p=p, training=training)
    return pl.pallas_call(
        kernel,
        out_shape=(jax.ShapeDtypeStruct((N, D), x_emb.dtype),
                   jax.ShapeDtypeStruct((N, out3), x_emb.dtype)),
        grid_spec=pltpu.PrefetchScalarGridSpec(
            num_scalar_prefetch=1,                     # seed lives in SMEM
            grid=grid,
            in_specs=[
                pl.BlockSpec((t, D), x_idx),
                pl.BlockSpec((t, D), pe_idx),
                pl.BlockSpec((D, out3), lambda b, si, seed_ref: (0, 0)),
                pl.BlockSpec((1, out3), lambda b, si, seed_ref: (0, 0)),
            ],
            out_specs=(
                pl.BlockSpec((t, D), x_idx),
                pl.BlockSpec((t, out3), x_idx),
            ),
        ),
        compiler_params=_compiler_params(("parallel", "parallel")),
    )(seed_arr, x_emb, pe_in, w_in_t, b_in)


def causal_self_attention(qkv, *, batch, seq_len, num_heads, d_model):
    """qkv: (B*S, 3*D) batch-major rows. Returns merged context (B*S, D)."""
    N, D3 = qkv.shape
    hd = d_model // num_heads
    scale = 1.0 / math.sqrt(hd)
    # TODO(synk): for long sequences switch to a flash-style KV-tiled online softmax
    # (this kernel holds the full S x S score block per batch step) and pad S to a
    # multiple of 8 sublanes if it is not already.
    return pl.pallas_call(
        functools.partial(_causal_mha_kernel, num_heads=num_heads,
                          d_model=d_model, scale=scale),
        out_shape=jax.ShapeDtypeStruct((N, d_model), qkv.dtype),
        grid_spec=pltpu.PrefetchScalarGridSpec(
            num_scalar_prefetch=0,
            grid=(batch,),
            in_specs=[pl.BlockSpec((seq_len, D3), lambda b: (b, 0))],
            out_specs=pl.BlockSpec((seq_len, d_model), lambda b: (b, 0)),
        ),
        compiler_params=_compiler_params(("parallel",)),
    )(qkv)


def linear_residual_layernorm(x2d, w_t, b, residual, gamma, beta, *, eps=_LN_EPS):
    """LayerNorm(residual + x @ W^T + b); W passed pre-transposed as (in, out)."""
    N, in_f = x2d.shape
    out_f = w_t.shape[1]
    itemsize = max(x2d.dtype.itemsize, 4)
    per_row = (in_f + 3 * out_f) * itemsize
    resident = (w_t.size + 3 * out_f) * w_t.dtype.itemsize
    t = _row_tile(N, per_row, 2 * resident,
                  row_multiple=8 if x2d.dtype.itemsize >= 4 else 16)
    return pl.pallas_call(
        functools.partial(_linear_residual_ln_kernel, eps=eps),
        out_shape=jax.ShapeDtypeStruct((N, out_f), x2d.dtype),
        grid_spec=pltpu.PrefetchScalarGridSpec(
            num_scalar_prefetch=0,
            grid=(N // t,),
            in_specs=[
                pl.BlockSpec((t, in_f), lambda i: (i, 0)),
                pl.BlockSpec((in_f, out_f), lambda i: (0, 0)),   # weight stays resident
                pl.BlockSpec((1, out_f), lambda i: (0, 0)),
                pl.BlockSpec((t, out_f), lambda i: (i, 0)),      # residual, same tiling
                pl.BlockSpec((1, out_f), lambda i: (0, 0)),
                pl.BlockSpec((1, out_f), lambda i: (0, 0)),
            ],
            out_specs=pl.BlockSpec((t, out_f), lambda i: (i, 0)),
        ),
        compiler_params=_compiler_params(("parallel",)),
    )(x2d, w_t, b, residual, gamma, beta)


def ffn_residual_layernorm(x2d, w1_t, b1, w2_t, b2, gamma, beta, *, eps=_LN_EPS):
    """LayerNorm(x + linear2(relu(linear1(x)))) — FF chunked over an 'arbitrary' axis."""
    N, D = x2d.shape
    FF = w1_t.shape[1]
    tff = _ff_chunk(FF)
    n_ff = FF // tff
    itemsize = max(x2d.dtype.itemsize, 4)
    per_row = 2 * D * itemsize + D * 4                   # x in, out, f32 accumulator
    resident = (D * tff + tff * D + tff + 3 * D) * w1_t.dtype.itemsize
    t = _row_tile(N, per_row, 2 * resident,
                  row_multiple=8 if x2d.dtype.itemsize >= 4 else 16)
    return pl.pallas_call(
        functools.partial(_ffn_residual_ln_kernel, eps=eps),
        out_shape=jax.ShapeDtypeStruct((N, D), x2d.dtype),
        grid_spec=pltpu.PrefetchScalarGridSpec(
            num_scalar_prefetch=0,
            grid=(N // t, n_ff),
            in_specs=[
                pl.BlockSpec((t, D), lambda i, c: (i, 0)),       # x (also the residual)
                pl.BlockSpec((D, tff), lambda i, c: (0, c)),     # W1^T column chunk
                pl.BlockSpec((1, tff), lambda i, c: (0, c)),
                pl.BlockSpec((tff, D), lambda i, c: (c, 0)),     # W2^T row chunk
                pl.BlockSpec((1, D), lambda i, c: (0, 0)),
                pl.BlockSpec((1, D), lambda i, c: (0, 0)),
                pl.BlockSpec((1, D), lambda i, c: (0, 0)),
            ],
            out_specs=pl.BlockSpec((t, D), lambda i, c: (i, 0)),
            scratch_shapes=[pltpu.VMEM((t, D), jnp.float32)],
        ),
        compiler_params=_compiler_params(("parallel", "arbitrary")),
    )(x2d, w1_t, b1, w2_t, b2, gamma, beta)


def linear_log_softmax(x2d, w_t, b):
    """log_softmax(x @ W^T + b, axis=-1) fused; W passed pre-transposed."""
    N, in_f = x2d.shape
    out_f = w_t.shape[1]
    # TODO(synk): for realistic vocab sizes, tile out_f over a grid axis with an
    # online / two-pass LSE instead of holding the full-vocab logits per block.
    itemsize = max(x2d.dtype.itemsize, 4)
    per_row = (in_f + 2 * out_f) * itemsize
    resident = (w_t.size + out_f) * w_t.dtype.itemsize
    t = _row_tile(N, per_row, 2 * resident,
                  row_multiple=8 if x2d.dtype.itemsize >= 4 else 16)
    return pl.pallas_call(
        _linear_logsoftmax_kernel,
        out_shape=jax.ShapeDtypeStruct((N, out_f), x2d.dtype),
        grid_spec=pltpu.PrefetchScalarGridSpec(
            num_scalar_prefetch=0,
            grid=(N // t,),
            in_specs=[
                pl.BlockSpec((t, in_f), lambda i: (i, 0)),
                pl.BlockSpec((in_f, out_f), lambda i: (0, 0)),
                pl.BlockSpec((1, out_f), lambda i: (0, 0)),
            ],
            out_specs=pl.BlockSpec((t, out_f), lambda i: (i, 0)),
        ),
        compiler_params=_compiler_params(("parallel",)),
    )(x2d, w_t, b)


# ----------------------------------------------------------------------------
# Parameter preparation (one-time) and the full forward pass
# ----------------------------------------------------------------------------
def prepare_decoder_params(params, *, compute_dtype=None):
    """One-time conversion of torch-convention parameters into the kernel layout.

    * nn.Linear weights (out, in) are pre-transposed to (in, out) ONCE here — no
      per-forward XLA weight transpose (HBM read+write of every weight) is paid.
    * biases / LN params become (1, out) lane-dense rows.
    * Pass compute_dtype=jnp.bfloat16 to store weights/embeddings in bf16 and feed
      the MXU bf16 operands; elementwise math inside the kernels stays f32.
    """
    cast = (lambda a: a.astype(compute_dtype)) if compute_dtype is not None else (lambda a: a)
    row = lambda a: cast(a.reshape(1, -1))
    return {
        "emb": cast(params["emb"]),
        "pe": cast(params["pe"]),
        "w_in_t": cast(params["w_in"].T), "b_in": row(params["b_in"]),
        "w_out_t": cast(params["w_out_proj"].T), "b_out": row(params["b_out_proj"]),
        "g1": row(params["g1"]), "be1": row(params["be1"]),
        "w1_t": cast(params["w1"].T), "b1": row(params["b1"]),
        "w2_t": cast(params["w2"].T), "b2": row(params["b2"]),
        "g2": row(params["g2"]), "be2": row(params["be2"]),
        "w_fc_t": cast(params["w_fc"].T), "b_fc": row(params["b_fc"]),
    }


def transformer_decoder_forward(ids_SB, kp, *, num_heads, dropout_p=0.1,
                                training=False, seed=0):
    """ids_SB: (S, B) int token ids. Returns (S, B, vocab) log-probabilities."""
    S, B = ids_SB.shape
    D = kp["emb"].shape[1]
    N = B * S

    # Lane-dense, batch-major 2-D activation layout: row r <-> (b = r // S, s = r % S).
    ids_flat = ids_SB.astype(jnp.int32).transpose(1, 0).reshape(N)
    # TODO(synk): the embedding lookup is a data-dependent row gather; it is left to
    # XLA's native gather (jnp.take) instead of a per-row Pallas DMA loop.
    x_emb = jnp.take(kp["emb"], ids_flat, axis=0)                     # (N, D)

    # Fused: (emb + pe) [+ dropout] -> qkv projection (also emits x_pe for residual).
    x_pe, qkv = embed_pe_qkv(x_emb, kp["pe"], kp["w_in_t"], kp["b_in"],
                             batch=B, seq_len=S, p=dropout_p,
                             training=training, seed=seed)            # (N, D), (N, 3D)

    # Masked multi-head self-attention; heads read straight out of the qkv buffer,
    # merged context written lane-dense per batch (no XLA head split/merge).
    ctx = causal_self_attention(qkv, batch=B, seq_len=S,
                                num_heads=num_heads, d_model=D)       # (N, D)

    # out_proj + residual + LayerNorm1 fused.
    # TODO(synk): training-mode dropout inside the block (attn-weight dropout,
    # dropout1/2) is not implemented; eval-mode (identity) semantics are exact.
    x1 = linear_residual_layernorm(ctx, kp["w_out_t"], kp["b_out"],
                                   x_pe, kp["g1"], kp["be1"])          # (N, D)

    # linear1 + ReLU + linear2 + residual + LayerNorm2 fused (no (N, FF) HBM buffer).
    x2 = ffn_residual_layernorm(x1, kp["w1_t"], kp["b1"], kp["w2_t"], kp["b2"],
                                kp["g2"], kp["be2"])                   # (N, D)

    # Final projection + LogSoftmax fused.
    logp = linear_log_softmax(x2, kp["w_fc_t"], kp["b_fc"])            # (N, V)

    V = kp["w_fc_t"].shape[1]
    return logp.reshape(B, S, V).transpose(1, 0, 2)                    # (S, B, V)


# ----------------------------------------------------------------------------
# Pure-JAX reference (mirrors the PyTorch module in eval mode)
# ----------------------------------------------------------------------------
def _layer_norm_ref(x, g, b, eps=_LN_EPS):
    mu = jnp.mean(x, axis=-1, keepdims=True)
    var = jnp.mean(jnp.square(x - mu), axis=-1, keepdims=True)
    return (x - mu) * jax.lax.rsqrt(var + eps) * g + b


def reference_forward(ids_SB, params, num_heads):
    HI = jax.lax.Precision.HIGHEST
    S, B = ids_SB.shape
    D = params["emb"].shape[1]
    H = num_heads
    hd = D // H
    x = jnp.take(params["emb"], ids_SB, axis=0)                      # (S, B, D)
    x = x + params["pe"][:S][:, None, :]
    qkv = jnp.einsum("sbd,ed->sbe", x, params["w_in"], precision=HI) + params["b_in"]
    q, k, v = jnp.split(qkv, 3, axis=-1)
    heads = lambda t: t.reshape(S, B, H, hd).transpose(1, 2, 0, 3)   # (B, H, S, hd)
    q, k, v = heads(q), heads(k), heads(v)
    scores = jnp.einsum("bhqd,bhkd->bhqk", q, k, precision=HI) / math.sqrt(hd)
    causal = jnp.tril(jnp.ones((S, S), dtype=bool))
    scores = jnp.where(causal, scores, -jnp.inf)
    attn = jax.nn.softmax(scores, axis=-1)
    ctx = jnp.einsum("bhqk,bhkd->bhqd", attn, v, precision=HI)
    ctx = ctx.transpose(2, 0, 1, 3).reshape(S, B, D)
    attn_out = (jnp.einsum("sbd,ed->sbe", ctx, params["w_out_proj"], precision=HI)
                + params["b_out_proj"])
    x = _layer_norm_ref(x + attn_out, params["g1"], params["be1"])
    h = jax.nn.relu(jnp.einsum("sbd,fd->sbf", x, params["w1"], precision=HI) + params["b1"])
    ff = jnp.einsum("sbf,df->sbd", h, params["w2"], precision=HI) + params["b2"]
    x = _layer_norm_ref(x + ff, params["g2"], params["be2"])
    logits = jnp.einsum("sbd,vd->sbv", x, params["w_fc"], precision=HI) + params["b_fc"]
    return jax.nn.log_softmax(logits, axis=-1)


# ----------------------------------------------------------------------------
# Parameters + self-test
# ----------------------------------------------------------------------------
def init_params(key, vocab, d_model, ff_hidden, max_len):
    ks = jax.random.split(key, 14)
    unif = lambda k, shape, s: jax.random.uniform(k, shape, jnp.float32, -s, s)
    sd = 1.0 / math.sqrt(d_model)
    sf = 1.0 / math.sqrt(ff_hidden)
    return {
        "emb": jax.random.normal(ks[0], (vocab, d_model), jnp.float32) * 0.1,
        "pe": make_positional_encoding_table(max_len, d_model),
        "w_in": unif(ks[1], (3 * d_model, d_model), sd),
        "b_in": unif(ks[2], (3 * d_model,), sd),
        "w_out_proj": unif(ks[3], (d_model, d_model), sd),
        "b_out_proj": unif(ks[4], (d_model,), sd),
        "g1": 1.0 + 0.1 * jax.random.normal(ks[5], (d_model,), jnp.float32),
        "be1": 0.1 * jax.random.normal(ks[6], (d_model,), jnp.float32),
        "w1": unif(ks[7], (ff_hidden, d_model), sd),
        "b1": unif(ks[8], (ff_hidden,), sd),
        "w2": unif(ks[9], (d_model, ff_hidden), sf),
        "b2": unif(ks[10], (d_model,), sf),
        "g2": 1.0 + 0.1 * jax.random.normal(ks[11], (d_model,), jnp.float32),
        "be2": 0.1 * jax.random.normal(ks[12], (d_model,), jnp.float32),
        "w_fc": unif(ks[13], (vocab, d_model), sd),
        "b_fc": jnp.zeros((vocab,), jnp.float32),
    }


if __name__ == "__main__":
    VOCAB, D_MODEL, NUM_HEADS, FF_HIDDEN = 50, 32, 2, 64
    S, B, MAX_LEN = 8, 2, 64
    DROPOUT = 0.1

    root = jax.random.PRNGKey(0)
    k_ids, k_par = jax.random.split(root)
    ids = jax.random.randint(k_ids, (S, B), 0, VOCAB, dtype=jnp.int32)
    params = init_params(k_par, VOCAB, D_MODEL, FF_HIDDEN, MAX_LEN)
    kparams = prepare_decoder_params(params)          # pre-transposed weights, done once

    fwd = jax.jit(functools.partial(
        transformer_decoder_forward, num_heads=NUM_HEADS,
        dropout_p=DROPOUT, training=False, seed=0))
    out = jax.block_until_ready(fwd(ids, kparams))

    ref = reference_forward(ids, params, NUM_HEADS)

    assert out.shape == (S, B, VOCAB), f"bad shape {out.shape}"
    assert bool(jnp.all(jnp.isfinite(out))), "non-finite output"
    # log-softmax rows must exponentiate to 1
    assert bool(jnp.allclose(jnp.sum(jnp.exp(out), axis=-1), 1.0, atol=1e-3)), \
        "log_softmax rows do not normalize"
    assert bool(jnp.allclose(out, ref, atol=2e-2, rtol=2e-2)), \
        f"mismatch vs reference (max abs diff {float(jnp.max(jnp.abs(out - ref)))})"

    print("KERNEL_OK")
</pallas_src>

<mosaic_0001>
module attributes {stable_mosaic.version = 11 : i64} {
  func.func @_linear_residual_ln_kernel(%arg0: i32, %arg1: memref<16x32xf32, #tpu.memory_space<vmem>>, %arg2: memref<32x32xf32, #tpu.memory_space<vmem>>, %arg3: memref<1x32xf32, #tpu.memory_space<vmem>>, %arg4: memref<16x32xf32, #tpu.memory_space<vmem>>, %arg5: memref<1x32xf32, #tpu.memory_space<vmem>>, %arg6: memref<1x32xf32, #tpu.memory_space<vmem>>, %arg7: memref<16x32xf32, #tpu.memory_space<vmem>>) attributes {dimension_semantics = [#tpu.dimension_semantics<parallel>], iteration_bounds = array<i64: 1>, scalar_prefetch = 0 : i64, scratch_operands = 0 : i64, tpu.core_type = #tpu.core_type<tc>, window_params = [{transform_indices = @transform_0, window_bounds = array<i64: 16, 32>}, {pipeline_mode = #tpu.pipeline_mode<synchronous>, transform_indices = @transform_1, window_bounds = array<i64: 32, 32>}, {pipeline_mode = #tpu.pipeline_mode<synchronous>, transform_indices = @transform_2, window_bounds = array<i64: 1, 32>}, {transform_indices = @transform_3, window_bounds = array<i64: 16, 32>}, {pipeline_mode = #tpu.pipeline_mode<synchronous>, transform_indices = @transform_4, window_bounds = array<i64: 1, 32>}, {pipeline_mode = #tpu.pipeline_mode<synchronous>, transform_indices = @transform_5, window_bounds = array<i64: 1, 32>}, {transform_indices = @transform_6, window_bounds = array<i64: 16, 32>}]} {
    %c0 = arith.constant 0 : index
    %c0_0 = arith.constant 0 : index
    %0 = vector.load %arg1[%c0, %c0_0] : memref<16x32xf32, #tpu.memory_space<vmem>>, vector<16x32xf32>
    %c0_1 = arith.constant 0 : index
    %c0_2 = arith.constant 0 : index
    %1 = vector.load %arg2[%c0_1, %c0_2] : memref<32x32xf32, #tpu.memory_space<vmem>>, vector<32x32xf32>
    %cst = arith.constant dense<0.000000e+00> : vector<16x32xf32>
    %2 = tpu.matmul %0, %1, %cst {dimension_numbers = #tpu.dot_dimension_numbers<[1], [0], [0], [1], [0, 0, 1, 1], [], []>} : vector<16x32xf32>, vector<32x32xf32>, vector<16x32xf32> -> vector<16x32xf32>
    %c0_3 = arith.constant 0 : index
    %c0_4 = arith.constant 0 : index
    %3 = vector.load %arg3[%c0_3, %c0_4] : memref<1x32xf32, #tpu.memory_space<vmem>>, vector<1x32xf32>
    %4 = vector.broadcast %3 : vector<1x32xf32> to vector<16x32xf32>
    %5 = arith.addf %2, %4 : vector<16x32xf32>
    %c0_5 = arith.constant 0 : index
    %c0_6 = arith.constant 0 : index
    %6 = vector.load %arg4[%c0_5, %c0_6] : memref<16x32xf32, #tpu.memory_space<vmem>>, vector<16x32xf32>
    %7 = arith.addf %5, %6 : vector<16x32xf32>
    %cst_7 = arith.constant dense<0.000000e+00> : vector<16xf32>
    %8 = vector.multi_reduction <add>, %7, %cst_7 [1] : vector<16x32xf32> to vector<16xf32>
    %9 = vector.shape_cast %8 : vector<16xf32> to vector<16x1xf32>
    %cst_8 = arith.constant 3.200000e+01 : f32
    %10 = vector.broadcast %cst_8 : f32 to vector<16x1xf32>
    %11 = arith.divf %9, %10 : vector<16x1xf32>
    %12 = vector.broadcast %11 : vector<16x1xf32> to vector<16x32xf32>
    %13 = arith.subf %7, %12 : vector<16x32xf32>
    %14 = arith.mulf %13, %13 : vector<16x32xf32>
    %cst_9 = arith.constant dense<0.000000e+00> : vector<16xf32>
    %15 = vector.multi_reduction <add>, %14, %cst_9 [1] : vector<16x32xf32> to vector<16xf32>
    %16 = vector.shape_cast %15 : vector<16xf32> to vector<16x1xf32>
    %cst_10 = arith.constant 3.200000e+01 : f32
    %17 = vector.broadcast %cst_10 : f32 to vector<16x1xf32>
    %18 = arith.divf %16, %17 : vector<16x1xf32>
    %19 = vector.broadcast %11 : vector<16x1xf32> to vector<16x32xf32>
    %20 = arith.subf %7, %19 : vector<16x32xf32>
    %cst_11 = arith.constant 9.99999974E-6 : f32
    %21 = vector.broadcast %cst_11 : f32 to vector<16x1xf32>
    %22 = arith.addf %18, %21 : vector<16x1xf32>
    %23 = math.rsqrt %22 : vector<16x1xf32>
    %24 = vector.broadcast %23 : vector<16x1xf32> to vector<16x32xf32>
    %25 = arith.mulf %20, %24 : vector<16x32xf32>
    %c0_12 = arith.constant 0 : index
    %c0_13 = arith.constant 0 : index
    %26 = vector.load %arg5[%c0_12, %c0_13] : memref<1x32xf32, #tpu.memory_space<vmem>>, vector<1x32xf32>
    %27 = vector.broadcast %26 : vector<1x32xf32> to vector<16x32xf32>
    %28 = arith.mulf %25, %27 : vector<16x32xf32>
    %c0_14 = arith.constant 0 : index
    %c0_15 = arith.constant 0 : index
    %29 = vector.load %arg6[%c0_14, %c0_15] : memref<1x32xf32, #tpu.memory_space<vmem>>, vector<1x32xf32>
    %30 = vector.broadcast %29 : vector<1x32xf32> to vector<16x32xf32>
    %31 = arith.addf %28, %30 : vector<16x32xf32>
    %c0_16 = arith.constant 0 : index
    %c0_17 = arith.constant 0 : index
    %32 = vector.load %arg7[%c0_16, %c0_17] : memref<16x32xf32, #tpu.memory_space<vmem>>, vector<16x32xf32>
    tpu.vector_store %arg7[%c0_16, %c0_17], %31 {strides = array<i32>} : memref<16x32xf32, #tpu.memory_space<vmem>>, vector<16x32xf32>,
    return
  }
  func.func @transform_0(%arg0: i32) -> (i32, i32) {
    %c0_i32 = arith.constant 0 : i32
    %c0_i32_0 = arith.constant 0 : i32
    return %arg0, %c0_i32 : i32, i32
  }
  func.func @transform_1(%arg0: i32) -> (i32, i32) {
    %c0_i32 = arith.constant 0 : i32
    %c0_i32_0 = arith.constant 0 : i32
    %c0_i32_1 = arith.constant 0 : i32
    return %c0_i32, %c0_i32_0 : i32, i32
  }
  func.func @transform_2(%arg0: i32) -> (i32, i32) {
    %c0_i32 = arith.constant 0 : i32
    %c0_i32_0 = arith.constant 0 : i32
    %c0_i32_1 = arith.constant 0 : i32
    return %c0_i32, %c0_i32_0 : i32, i32
  }
  func.func @transform_3(%arg0: i32) -> (i32, i32) {
    %c0_i32 = arith.constant 0 : i32
    %c0_i32_0 = arith.constant 0 : i32
    return %arg0, %c0_i32 : i32, i32
  }
  func.func @transform_4(%arg0: i32) -> (i32, i32) {
    %c0_i32 = arith.constant 0 : i32
    %c0_i32_0 = arith.constant 0 : i32
    %c0_i32_1 = arith.constant 0 : i32
    return %c0_i32, %c0_i32_0 : i32, i32
  }
  func.func @transform_5(%arg0: i32) -> (i32, i32) {
    %c0_i32 = arith.constant 0 : i32
    %c0_i32_0 = arith.constant 0 : i32
    %c0_i32_1 = arith.constant 0 : i32
    return %c0_i32, %c0_i32_0 : i32, i32
  }
  func.func @transform_6(%arg0: i32) -> (i32, i32) {
    %c0_i32 = arith.constant 0 : i32
    %c0_i32_0 = arith.constant 0 : i32
    return %arg0, %c0_i32 : i32, i32
  }
}

module attributes {stable_mosaic.version = 11 : i64} {
  func.func @_embed_pe_qkv_kernel(%arg0: i32, %arg1: i32, %arg2: memref<1xi32, #tpu.memory_space<smem>>, %arg3: memref<8x32xf32, #tpu.memory_space<vmem>>, %arg4: memref<8x32xf32, #tpu.memory_space<vmem>>, %arg5: memref<32x96xf32, #tpu.memory_space<vmem>>, %arg6: memref<1x96xf32, #tpu.memory_space<vmem>>, %arg7: memref<8x32xf32, #tpu.memory_space<vmem>>, %arg8: memref<8x96xf32, #tpu.memory_space<vmem>>) attributes {dimension_semantics = [#tpu.dimension_semantics<parallel>, #tpu.dimension_semantics<parallel>], iteration_bounds = array<i64: 2, 1>, scalar_prefetch = 1 : i64, scratch_operands = 0 : i64, tpu.core_type = #tpu.core_type<tc>, window_params = [{transform_indices = @transform_0, window_bounds = array<i64: 8, 32>}, {transform_indices = @transform_1, window_bounds = array<i64: 8, 32>}, {pipeline_mode = #tpu.pipeline_mode<synchronous>, transform_indices = @transform_2, window_bounds = array<i64: 32, 96>}, {pipeline_mode = #tpu.pipeline_mode<synchronous>, transform_indices = @transform_3, window_bounds = array<i64: 1, 96>}, {transform_indices = @transform_4, window_bounds = array<i64: 8, 32>}, {transform_indices = @transform_5, window_bounds = array<i64: 8, 96>}]} {
    %c0 = arith.constant 0 : index
    %c0_0 = arith.constant 0 : index
    %0 = vector.load %arg3[%c0, %c0_0] : memref<8x32xf32, #tpu.memory_space<vmem>>, vector<8x32xf32>
    %c0_1 = arith.constant 0 : index
    %c0_2 = arith.constant 0 : index
    %1 = vector.load %arg4[%c0_1, %c0_2] : memref<8x32xf32, #tpu.memory_space<vmem>>, vector<8x32xf32>
    %2 = arith.addf %0, %1 : vector<8x32xf32>
    %c0_3 = arith.constant 0 : index
    %c0_4 = arith.constant 0 : index
    %3 = vector.load %arg7[%c0_3, %c0_4] : memref<8x32xf32, #tpu.memory_space<vmem>>, vector<8x32xf32>
    tpu.vector_store %arg7[%c0_3, %c0_4], %2 {strides = array<i32>} : memref<8x32xf32, #tpu.memory_space<vmem>>, vector<8x32xf32>,
    %c0_5 = arith.constant 0 : index
    %c0_6 = arith.constant 0 : index
    %4 = vector.load %arg5[%c0_5, %c0_6] : memref<32x96xf32, #tpu.memory_space<vmem>>, vector<32x96xf32>
    %cst = arith.constant dense<0.000000e+00> : vector<8x96xf32>
    %5 = tpu.matmul %2, %4, %cst {dimension_numbers = #tpu.dot_dimension_numbers<[1], [0], [0], [1], [0, 0, 1, 1], [], []>} : vector<8x32xf32>, vector<32x96xf32>, vector<8x96xf32> -> vector<8x96xf32>
    %c0_7 = arith.constant 0 : index
    %c0_8 = arith.constant 0 : index
    %6 = vector.load %arg6[%c0_7, %c0_8] : memref<1x96xf32, #tpu.memory_space<vmem>>, vector<1x96xf32>
    %7 = vector.broadcast %6 : vector<1x96xf32> to vector<8x96xf32>
    %8 = arith.addf %5, %7 : vector<8x96xf32>
    %c0_9 = arith.constant 0 : index
    %c0_10 = arith.constant 0 : index
    %9 = vector.load %arg8[%c0_9, %c0_10] : memref<8x96xf32, #tpu.memory_space<vmem>>, vector<8x96xf32>
    tpu.vector_store %arg8[%c0_9, %c0_10], %8 {strides = array<i32>} : memref<8x96xf32, #tpu.memory_space<vmem>>, vector<8x96xf32>,
    return
  }
  func.func @transform_0(%arg0: i32, %arg1: i32, %arg2: memref<1xi32, #tpu.memory_space<smem>>) -> (i32, i32) {
    %c1_i32 = arith.constant 1 : i32
    %0 = arith.muli %arg0, %c1_i32 : i32
    %1 = arith.addi %0, %arg1 : i32
    %c0_i32 = arith.constant 0 : i32
    %c0_i32_0 = arith.constant 0 : i32
    return %1, %c0_i32 : i32, i32
  }
  func.func @transform_1(%arg0: i32, %arg1: i32, %arg2: memref<1xi32, #tpu.memory_space<smem>>) -> (i32, i32) {
    %c0_i32 = arith.constant 0 : i32
    %c0_i32_0 = arith.constant 0 : i32
    return %arg1, %c0_i32 : i32, i32
  }
  func.func @transform_2(%arg0: i32, %arg1: i32, %arg2: memref<1xi32, #tpu.memory_space<smem>>) -> (i32, i32) {
    %c0_i32 = arith.constant 0 : i32
    %c0_i32_0 = arith.constant 0 : i32
    %c0_i32_1 = arith.constant 0 : i32
    return %c0_i32, %c0_i32_0 : i32, i32
  }
  func.func @transform_3(%arg0: i32, %arg1: i32, %arg2: memref<1xi32, #tpu.memory_space<smem>>) -> (i32, i32) {
    %c0_i32 = arith.constant 0 : i32
    %c0_i32_0 = arith.constant 0 : i32
    %c0_i32_1 = arith.constant 0 : i32
    return %c0_i32, %c0_i32_0 : i32, i32
  }
  func.func @transform_4(%arg0: i32, %arg1: i32, %arg2: memref<1xi32, #tpu.memory_space<smem>>) -> (i32, i32) {
    %c1_i32 = arith.constant 1 : i32
    %0 = arith.muli %arg0, %c1_i32 : i32
    %1 = arith.addi %0, %arg1 : i32
    %c0_i32 = arith.constant 0 : i32
    %c0_i32_0 = arith.constant 0 : i32
    return %1, %c0_i32 : i32, i32
  }
  func.func @transform_5(%arg0: i32, %arg1: i32, %arg2: memref<1xi32, #tpu.memory_space<smem>>) -> (i32, i32) {
    %c1_i32 = arith.constant 1 : i32
    %0 = arith.muli %arg0, %c1_i32 : i32
    %1 = arith.addi %0, %arg1 : i32
    %c0_i32 = arith.constant 0 : i32
    %c0_i32_0 = arith.constant 0 : i32
    return %1, %c0_i32 : i32, i32
  }
}

module attributes {stable_mosaic.version = 11 : i64} {
  func.func @_ffn_residual_ln_kernel(%arg0: i32, %arg1: i32, %arg2: memref<16x32xf32, #tpu.memory_space<vmem>>, %arg3: memref<32x64xf32, #tpu.memory_space<vmem>>, %arg4: memref<1x64xf32, #tpu.memory_space<vmem>>, %arg5: memref<64x32xf32, #tpu.memory_space<vmem>>, %arg6: memref<1x32xf32, #tpu.memory_space<vmem>>, %arg7: memref<1x32xf32, #tpu.memory_space<vmem>>, %arg8: memref<1x32xf32, #tpu.memory_space<vmem>>, %arg9: memref<16x32xf32, #tpu.memory_space<vmem>>, %arg10: memref<16x32xf32, #tpu.memory_space<vmem>>) attributes {dimension_semantics = [#tpu.dimension_semantics<parallel>, #tpu.dimension_semantics<arbitrary>], iteration_bounds = array<i64: 1, 1>, scalar_prefetch = 0 : i64, scratch_operands = 1 : i64, tpu.core_type = #tpu.core_type<tc>, window_params = [{transform_indices = @transform_0, window_bounds = array<i64: 16, 32>}, {transform_indices = @transform_1, window_bounds = array<i64: 32, 64>}, {transform_indices = @transform_2, window_bounds = array<i64: 1, 64>}, {transform_indices = @transform_3, window_bounds = array<i64: 64, 32>}, {pipeline_mode = #tpu.pipeline_mode<synchronous>, transform_indices = @transform_4, window_bounds = array<i64: 1, 32>}, {pipeline_mode = #tpu.pipeline_mode<synchronous>, transform_indices = @transform_5, window_bounds = array<i64: 1, 32>}, {pipeline_mode = #tpu.pipeline_mode<synchronous>, transform_indices = @transform_6, window_bounds = array<i64: 1, 32>}, {transform_indices = @transform_7, window_bounds = array<i64: 16, 32>}]} {
    %c0_i32 = arith.constant 0 : i32
    %0 = arith.cmpi eq, %arg1, %c0_i32 : i32
    %1 = arith.extui %0 : i1 to i32
    %c0_i32_0 = arith.constant 0 : i32
    %2 = arith.cmpi ne, %1, %c0_i32_0 : i32
    scf.if %2 {
      %cst_16 = arith.constant 0.000000e+00 : f32
      %19 = vector.broadcast %cst_16 : f32 to vector<16x32xf32>
      %c0_17 = arith.constant 0 : index
      %c0_18 = arith.constant 0 : index
      %20 = vector.load %arg10[%c0_17, %c0_18] : memref<16x32xf32, #tpu.memory_space<vmem>>, vector<16x32xf32>
      tpu.vector_store %arg10[%c0_17, %c0_18], %19 {strides = array<i32>} : memref<16x32xf32, #tpu.memory_space<vmem>>, vector<16x32xf32>,
    } else {
    }
    %c0 = arith.constant 0 : index
    %c0_1 = arith.constant 0 : index
    %3 = vector.load %arg2[%c0, %c0_1] : memref<16x32xf32, #tpu.memory_space<vmem>>, vector<16x32xf32>
    %c0_2 = arith.constant 0 : index
    %c0_3 = arith.constant 0 : index
    %4 = vector.load %arg3[%c0_2, %c0_3] : memref<32x64xf32, #tpu.memory_space<vmem>>, vector<32x64xf32>
    %cst = arith.constant dense<0.000000e+00> : vector<16x64xf32>
    %5 = tpu.matmul %3, %4, %cst {dimension_numbers = #tpu.dot_dimension_numbers<[1], [0], [0], [1], [0, 0, 1, 1], [], []>} : vector<16x32xf32>, vector<32x64xf32>, vector<16x64xf32> -> vector<16x64xf32>
    %c0_4 = arith.constant 0 : index
    %c0_5 = arith.constant 0 : index
    %6 = vector.load %arg4[%c0_4, %c0_5] : memref<1x64xf32, #tpu.memory_space<vmem>>, vector<1x64xf32>
    %7 = vector.broadcast %6 : vector<1x64xf32> to vector<16x64xf32>
    %8 = arith.addf %5, %7 : vector<16x64xf32>
    %cst_6 = arith.constant 0.000000e+00 : f32
    %9 = vector.broadcast %cst_6 : f32 to vector<16x64xf32>
    %10 = arith.maximumf %8, %9 : vector<16x64xf32>
    %c0_7 = arith.constant 0 : index
    %c0_8 = arith.constant 0 : index
    %11 = vector.load %arg10[%c0_7, %c0_8] : memref<16x32xf32, #tpu.memory_space<vmem>>, vector<16x32xf32>
    %c0_9 = arith.constant 0 : index
    %c0_10 = arith.constant 0 : index
    %12 = vector.load %arg5[%c0_9, %c0_10] : memref<64x32xf32, #tpu.memory_space<vmem>>, vector<64x32xf32>
    %cst_11 = arith.constant dense<0.000000e+00> : vector<16x32xf32>
    %13 = tpu.matmul %10, %12, %cst_11 {dimension_numbers = #tpu.dot_dimension_numbers<[1], [0], [0], [1], [0, 0, 1, 1], [], []>} : vector<16x64xf32>, vector<64x32xf32>, vector<16x32xf32> -> vector<16x32xf32>
    %14 = arith.addf %11, %13 : vector<16x32xf32>
    %c0_12 = arith.constant 0 : index
    %c0_13 = arith.constant 0 : index
    %15 = vector.load %arg10[%c0_12, %c0_13] : memref<16x32xf32, #tpu.memory_space<vmem>>, vector<16x32xf32>
    tpu.vector_store %arg10[%c0_12, %c0_13], %14 {strides = array<i32>} : memref<16x32xf32, #tpu.memory_space<vmem>>, vector<16x32xf32>,
    %c0_i32_14 = arith.constant 0 : i32
    %16 = arith.cmpi eq, %arg1, %c0_i32_14 : i32
    %17 = arith.extui %16 : i1 to i32
    %c0_i32_15 = arith.constant 0 : i32
    %18 = arith.cmpi ne, %17, %c0_i32_15 : i32
    scf.if %18 {
      %c0_16 = arith.constant 0 : index
      %c0_17 = arith.constant 0 : index
      %19 = vector.load %arg10[%c0_16, %c0_17] : memref<16x32xf32, #tpu.memory_space<vmem>>, vector<16x32xf32>
      %c0_18 = arith.constant 0 : index
      %c0_19 = arith.constant 0 : index
      %20 = vector.load %arg6[%c0_18, %c0_19] : memref<1x32xf32, #tpu.memory_space<vmem>>, vector<1x32xf32>
      %21 = vector.broadcast %20 : vector<1x32xf32> to vector<16x32xf32>
      %22 = arith.addf %19, %21 : vector<16x32xf32>
      %23 = arith.addf %22, %3 : vector<16x32xf32>
      %cst_20 = arith.constant dense<0.000000e+00> : vector<16xf32>
      %24 = vector.multi_reduction <add>, %23, %cst_20 [1] : vector<16x32xf32> to vector<16xf32>
      %25 = vector.shape_cast %24 : vector<16xf32> to vector<16x1xf32>
      %cst_21 = arith.constant 3.200000e+01 : f32
      %26 = vector.broadcast %cst_21 : f32 to vector<16x1xf32>
      %27 = arith.divf %25, %26 : vector<16x1xf32>
      %28 = vector.broadcast %27 : vector<16x1xf32> to vector<16x32xf32>
      %29 = arith.subf %23, %28 : vector<16x32xf32>
      %30 = arith.mulf %29, %29 : vector<16x32xf32>
      %cst_22 = arith.constant dense<0.000000e+00> : vector<16xf32>
      %31 = vector.multi_reduction <add>, %30, %cst_22 [1] : vector<16x32xf32> to vector<16xf32>
      %32 = vector.shape_cast %31 : vector<16xf32> to vector<16x1xf32>
      %cst_23 = arith.constant 3.200000e+01 : f32
      %33 = vector.broadcast %cst_23 : f32 to vector<16x1xf32>
      %34 = arith.divf %32, %33 : vector<16x1xf32>
      %35 = vector.broadcast %27 : vector<16x1xf32> to vector<16x32xf32>
      %36 = arith.subf %23, %35 : vector<16x32xf32>
      %cst_24 = arith.constant 9.99999974E-6 : f32
      %37 = vector.broadcast %cst_24 : f32 to vector<16x1xf32>
      %38 = arith.addf %34, %37 : vector<16x1xf32>
      %39 = math.rsqrt %38 : vector<16x1xf32>
      %40 = vector.broadcast %39 : vector<16x1xf32> to vector<16x32xf32>
      %41 = arith.mulf %36, %40 : vector<16x32xf32>
      %c0_25 = arith.constant 0 : index
      %c0_26 = arith.constant 0 : index
      %42 = vector.load %arg7[%c0_25, %c0_26] : memref<1x32xf32, #tpu.memory_space<vmem>>, vector<1x32xf32>
      %43 = vector.broadcast %42 : vector<1x32xf32> to vector<16x32xf32>
      %44 = arith.mulf %41, %43 : vector<16x32xf32>
      %c0_27 = arith.constant 0 : index
      %c0_28 = arith.constant 0 : index
      %45 = vector.load %arg8[%c0_27, %c0_28] : memref<1x32xf32, #tpu.memory_space<vmem>>, vector<1x32xf32>
      %46 = vector.broadcast %45 : vector<1x32xf32> to vector<16x32xf32>
      %47 = arith.addf %44, %46 : vector<16x32xf32>
      %c0_29 = arith.constant 0 : index
      %c0_30 = arith.constant 0 : index
      %48 = vector.load %arg9[%c0_29, %c0_30] : memref<16x32xf32, #tpu.memory_space<vmem>>, vector<16x32xf32>
      tpu.vector_store %arg9[%c0_29, %c0_30], %47 {strides = array<i32>} : memref<16x32xf32, #tpu.memory_space<vmem>>, vector<16x32xf32>,
    } else {
    }
    return
  }
  func.func @transform_0(%arg0: i32, %arg1: i32) -> (i32, i32) {
    %c0_i32 = arith.constant 0 : i32
    %c0_i32_0 = arith.constant 0 : i32
    return %arg0, %c0_i32 : i32, i32
  }
  func.func @transform_1(%arg0: i32, %arg1: i32) -> (i32, i32) {
    %c0_i32 = arith.constant 0 : i32
    %c0_i32_0 = arith.constant 0 : i32
    return %c0_i32, %arg1 : i32, i32
  }
  func.func @transform_2(%arg0: i32, %arg1: i32) -> (i32, i32) {
    %c0_i32 = arith.constant 0 : i32
    %c0_i32_0 = arith.constant 0 : i32
    return %c0_i32, %arg1 : i32, i32
  }
  func.func @transform_3(%arg0: i32, %arg1: i32) -> (i32, i32) {
    %c0_i32 = arith.constant 0 : i32
    %c0_i32_0 = arith.constant 0 : i32
    return %arg1, %c0_i32 : i32, i32
  }
  func.func @transform_4(%arg0: i32, %arg1: i32) -> (i32, i32) {
    %c0_i32 = arith.constant 0 : i32
    %c0_i32_0 = arith.constant 0 : i32
    %c0_i32_1 = arith.constant 0 : i32
    return %c0_i32, %c0_i32_0 : i32, i32
  }
  func.func @transform_5(%arg0: i32, %arg1: i32) -> (i32, i32) {
    %c0_i32 = arith.constant 0 : i32
    %c0_i32_0 = arith.constant 0 : i32
    %c0_i32_1 = arith.constant 0 : i32
    return %c0_i32, %c0_i32_0 : i32, i32
  }
  func.func @transform_6(%arg0: i32, %arg1: i32) -> (i32, i32) {
    %c0_i32 = arith.constant 0 : i32
    %c0_i32_0 = arith.constant 0 : i32
    %c0_i32_1 = arith.constant 0 : i32
    return %c0_i32, %c0_i32_0 : i32, i32
  }
  func.func @transform_7(%arg0: i32, %arg1: i32) -> (i32, i32) {
    %c0_i32 = arith.constant 0 : i32
    %c0_i32_0 = arith.constant 0 : i32
    return %arg0, %c0_i32 : i32, i32
  }
}

module attributes {stable_mosaic.version = 11 : i64} {
  func.func @_causal_mha_kernel(%arg0: i32, %arg1: memref<8x96xf32, #tpu.memory_space<vmem>>, %arg2: memref<8x32xf32, #tpu.memory_space<vmem>>) attributes {dimension_semantics = [#tpu.dimension_semantics<parallel>], iteration_bounds = array<i64: 2>, scalar_prefetch = 0 : i64, scratch_operands = 0 : i64, tpu.core_type = #tpu.core_type<tc>, window_params = [{transform_indices = @transform_0, window_bounds = array<i64: 8, 96>}, {transform_indices = @transform_1, window_bounds = array<i64: 8, 32>}]} {
    %c0 = arith.constant 0 : index
    %c0_0 = arith.constant 0 : index
    %0 = vector.load %arg1[%c0, %c0_0] : memref<8x96xf32, #tpu.memory_space<vmem>>, vector<8x96xf32>
    %1 = tpu.iota {dimensions = array<i32: 0>} : vector<8x8xi32>
    %2 = tpu.iota {dimensions = array<i32: 1>} : vector<8x8xi32>
    %3 = arith.cmpi sle, %2, %1 : vector<8x8xi32>
    %4 = vector.extract_strided_slice %0 {offsets = [0, 0], sizes = [8, 16], strides = [1, 1]} : vector<8x96xf32> to vector<8x16xf32>
    %5 = vector.extract_strided_slice %0 {offsets = [0, 32], sizes = [8, 16], strides = [1, 1]} : vector<8x96xf32> to vector<8x16xf32>
    %6 = vector.extract_strided_slice %0 {offsets = [0, 64], sizes = [8, 16], strides = [1, 1]} : vector<8x96xf32> to vector<8x16xf32>
    "tpu.trace_start"() <{level = 10 : i32, message = "qd,kd->qk"}> : () -> ()
    %cst = arith.constant dense<0.000000e+00> : vector<8x8xf32>
    %7 = tpu.matmul %4, %5, %cst {dimension_numbers = #tpu.dot_dimension_numbers<[1], [1], [0], [0], [0, 0, 1, 0], [], []>} : vector<8x16xf32>, vector<8x16xf32>, vector<8x8xf32> -> vector<8x8xf32>
    "tpu.trace_stop"() : () -> ()
    %cst_1 = arith.constant 2.500000e-01 : f32
    %8 = vector.broadcast %cst_1 : f32 to vector<8x8xf32>
    %9 = arith.mulf %7, %8 : vector<8x8xf32>
    %cst_2 = arith.constant -1.000000e+30 : f32
    %10 = vector.broadcast %cst_2 : f32 to vector<8x8xf32>
    %11 = arith.select %3, %9, %10 : vector<8x8xi1>, vector<8x8xf32>
    %cst_3 = arith.constant dense<0xFF800000> : vector<8xf32>
    %12 = vector.multi_reduction <maximumf>, %11, %cst_3 [1] : vector<8x8xf32> to vector<8xf32>
    %13 = vector.shape_cast %12 : vector<8xf32> to vector<8x1xf32>
    %14 = vector.broadcast %13 : vector<8x1xf32> to vector<8x8xf32>
    %15 = arith.subf %11, %14 : vector<8x8xf32>
    %16 = math.exp %15 : vector<8x8xf32>
    %cst_4 = arith.constant dense<0.000000e+00> : vector<8xf32>
    %17 = vector.multi_reduction <add>, %16, %cst_4 [1] : vector<8x8xf32> to vector<8xf32>
    %18 = vector.shape_cast %17 : vector<8xf32> to vector<8x1xf32>
    %19 = tpu.reciprocal %18 {approx = true} : vector<8x1xf32> -> vector<8x1xf32>
    %20 = vector.broadcast %19 : vector<8x1xf32> to vector<8x8xf32>
    %21 = arith.mulf %16, %20 : vector<8x8xf32>
    %cst_5 = arith.constant dense<0.000000e+00> : vector<8x16xf32>
    %22 = tpu.matmul %21, %6, %cst_5 {dimension_numbers = #tpu.dot_dimension_numbers<[1], [0], [0], [1], [0, 0, 1, 1], [], []>} : vector<8x8xf32>, vector<8x16xf32>, vector<8x16xf32> -> vector<8x16xf32>
    %23 = vector.extract_strided_slice %0 {offsets = [0, 16], sizes = [8, 16], strides = [1, 1]} : vector<8x96xf32> to vector<8x16xf32>
    %24 = vector.extract_strided_slice %0 {offsets = [0, 48], sizes = [8, 16], strides = [1, 1]} : vector<8x96xf32> to vector<8x16xf32>
    %25 = vector.extract_strided_slice %0 {offsets = [0, 80], sizes = [8, 16], strides = [1, 1]} : vector<8x96xf32> to vector<8x16xf32>
    "tpu.trace_start"() <{level = 10 : i32, message = "qd,kd->qk"}> : () -> ()
    %cst_6 = arith.constant dense<0.000000e+00> : vector<8x8xf32>
    %26 = tpu.matmul %23, %24, %cst_6 {dimension_numbers = #tpu.dot_dimension_numbers<[1], [1], [0], [0], [0, 0, 1, 0], [], []>} : vector<8x16xf32>, vector<8x16xf32>, vector<8x8xf32> -> vector<8x8xf32>
    "tpu.trace_stop"() : () -> ()
    %cst_7 = arith.constant 2.500000e-01 : f32
    %27 = vector.broadcast %cst_7 : f32 to vector<8x8xf32>
    %28 = arith.mulf %26, %27 : vector<8x8xf32>
    %cst_8 = arith.constant -1.000000e+30 : f32
    %29 = vector.broadcast %cst_8 : f32 to vector<8x8xf32>
    %30 = arith.select %3, %28, %29 : vector<8x8xi1>, vector<8x8xf32>
    %cst_9 = arith.constant dense<0xFF800000> : vector<8xf32>
    %31 = vector.multi_reduction <maximumf>, %30, %cst_9 [1] : vector<8x8xf32> to vector<8xf32>
    %32 = vector.shape_cast %31 : vector<8xf32> to vector<8x1xf32>
    %33 = vector.broadcast %32 : vector<8x1xf32> to vector<8x8xf32>
    %34 = arith.subf %30, %33 : vector<8x8xf32>
    %35 = math.exp %34 : vector<8x8xf32>
    %cst_10 = arith.constant dense<0.000000e+00> : vector<8xf32>
    %36 = vector.multi_reduction <add>, %35, %cst_10 [1] : vector<8x8xf32> to vector<8xf32>
    %37 = vector.shape_cast %36 : vector<8xf32> to vector<8x1xf32>
    %38 = tpu.reciprocal %37 {approx = true} : vector<8x1xf32> -> vector<8x1xf32>
    %39 = vector.broadcast %38 : vector<8x1xf32> to vector<8x8xf32>
    %40 = arith.mulf %35, %39 : vector<8x8xf32>
    %cst_11 = arith.constant dense<0.000000e+00> : vector<8x16xf32>
    %41 = tpu.matmul %40, %25, %cst_11 {dimension_numbers = #tpu.dot_dimension_numbers<[1], [0], [0], [1], [0, 0, 1, 1], [], []>} : vector<8x8xf32>, vector<8x16xf32>, vector<8x16xf32> -> vector<8x16xf32>
    %42 = tpu.concatenate %22, %41 in 1 : vector<8x16xf32>, vector<8x16xf32> -> vector<8x32xf32>
    %c0_12 = arith.constant 0 : index
    %c0_13 = arith.constant 0 : index
    %43 = vector.load %arg2[%c0_12, %c0_13] : memref<8x32xf32, #tpu.memory_space<vmem>>, vector<8x32xf32>
    tpu.vector_store %arg2[%c0_12, %c0_13], %42 {strides = array<i32>} : memref<8x32xf32, #tpu.memory_space<vmem>>, vector<8x32xf32>,
    return
  }
  func.func @transform_0(%arg0: i32) -> (i32, i32) {
    %c0_i32 = arith.constant 0 : i32
    %c0_i32_0 = arith.constant 0 : i32
    return %arg0, %c0_i32 : i32, i32
  }
  func.func @transform_1(%arg0: i32) -> (i32, i32) {
    %c0_i32 = arith.constant 0 : i32
    %c0_i32_0 = arith.constant 0 : i32
    return %arg0, %c0_i32 : i32, i32
  }
}

module attributes {stable_mosaic.version = 11 : i64} {
  func.func @_linear_logsoftmax_kernel(%arg0: i32, %arg1: memref<16x32xf32, #tpu.memory_space<vmem>>, %arg2: memref<32x50xf32, #tpu.memory_space<vmem>>, %arg3: memref<1x50xf32, #tpu.memory_space<vmem>>, %arg4: memref<16x50xf32, #tpu.memory_space<vmem>>) attributes {dimension_semantics = [#tpu.dimension_semantics<parallel>], iteration_bounds = array<i64: 1>, scalar_prefetch = 0 : i64, scratch_operands = 0 : i64, tpu.core_type = #tpu.core_type<tc>, window_params = [{transform_indices = @transform_0, window_bounds = array<i64: 16, 32>}, {pipeline_mode = #tpu.pipeline_mode<synchronous>, transform_indices = @transform_1, window_bounds = array<i64: 32, 50>}, {pipeline_mode = #tpu.pipeline_mode<synchronous>, transform_indices = @transform_2, window_bounds = array<i64: 1, 50>}, {transform_indices = @transform_3, window_bounds = array<i64: 16, 50>}]} {
    %c0 = arith.constant 0 : index
    %c0_0 = arith.constant 0 : index
    %0 = vector.load %arg1[%c0, %c0_0] : memref<16x32xf32, #tpu.memory_space<vmem>>, vector<16x32xf32>
    %c0_1 = arith.constant 0 : index
    %c0_2 = arith.constant 0 : index
    %1 = vector.load %arg2[%c0_1, %c0_2] : memref<32x50xf32, #tpu.memory_space<vmem>>, vector<32x50xf32>
    %cst = arith.constant dense<0.000000e+00> : vector<16x50xf32>
    %2 = tpu.matmul %0, %1, %cst {dimension_numbers = #tpu.dot_dimension_numbers<[1], [0], [0], [1], [0, 0, 1, 1], [], []>} : vector<16x32xf32>, vector<32x50xf32>, vector<16x50xf32> -> vector<16x50xf32>
    %c0_3 = arith.constant 0 : index
    %c0_4 = arith.constant 0 : index
    %3 = vector.load %arg3[%c0_3, %c0_4] : memref<1x50xf32, #tpu.memory_space<vmem>>, vector<1x50xf32>
    %4 = vector.broadcast %3 : vector<1x50xf32> to vector<16x50xf32>
    %5 = arith.addf %2, %4 : vector<16x50xf32>
    %cst_5 = arith.constant dense<0xFF800000> : vector<16xf32>
    %6 = vector.multi_reduction <maximumf>, %5, %cst_5 [1] : vector<16x50xf32> to vector<16xf32>
    %7 = vector.shape_cast %6 : vector<16xf32> to vector<16x1xf32>
    %8 = vector.broadcast %7 : vector<16x1xf32> to vector<16x50xf32>
    %9 = arith.subf %5, %8 : vector<16x50xf32>
    %10 = math.exp %9 : vector<16x50xf32>
    %cst_6 = arith.constant dense<0.000000e+00> : vector<16xf32>
    %11 = vector.multi_reduction <add>, %10, %cst_6 [1] : vector<16x50xf32> to vector<16xf32>
    %12 = vector.shape_cast %11 : vector<16xf32> to vector<16x1xf32>
    %13 = math.log %12 : vector<16x1xf32>
    %14 = arith.addf %13, %7 : vector<16x1xf32>
    %15 = vector.broadcast %14 : vector<16x1xf32> to vector<16x50xf32>
    %16 = arith.subf %5, %15 : vector<16x50xf32>
    %c0_7 = arith.constant 0 : index
    %c0_8 = arith.constant 0 : index
    %17 = vector.load %arg4[%c0_7, %c0_8] : memref<16x50xf32, #tpu.memory_space<vmem>>, vector<16x50xf32>
    tpu.vector_store %arg4[%c0_7, %c0_8], %16 {strides = array<i32>} : memref<16x50xf32, #tpu.memory_space<vmem>>, vector<16x50xf32>,
    return
  }
  func.func @transform_0(%arg0: i32) -> (i32, i32) {
    %c0_i32 = arith.constant 0 : i32
    %c0_i32_0 = arith.constant 0 : i32
    return %arg0, %c0_i32 : i32, i32
  }
  func.func @transform_1(%arg0: i32) -> (i32, i32) {
    %c0_i32 = arith.constant 0 : i32
    %c0_i32_0 = arith.constant 0 : i32
    %c0_i32_1 = arith.constant 0 : i32
    return %c0_i32, %c0_i32_0 : i32, i32
  }
  func.func @transform_2(%arg0: i32) -> (i32, i32) {
    %c0_i32 = arith.constant 0 : i32
    %c0_i32_0 = arith.constant 0 : i32
    %c0_i32_1 = arith.constant 0 : i32
    return %c0_i32, %c0_i32_0 : i32, i32
  }
  func.func @transform_3(%arg0: i32) -> (i32, i32) {
    %c0_i32 = arith.constant 0 : i32
    %c0_i32_0 = arith.constant 0 : i32
    return %arg0, %c0_i32 : i32, i32
  }
}

</mosaic_0001>

<bundles_post_ra>
// kernel: transformer_decoder_forward.7
= control target key start
LH: loop header
LB: loop body
LE: loop exit
PB: predicated region body
PF: predicated region fallthrough
CT: control target
= control target key end

     0   :  { %vm36_vm0 = vcmask 261120   ;;  %s281_s1 = inlined_call_operand.vmem [shape: f32[32,32], index: 1, kind: input, shape index: {}]   ;;  %s282_s0 = inlined_call_operand.vmem [shape: f32[16,32], index: 0, kind: input, shape index: {}]   ;;  %s283_s2 = inlined_call_operand.vmem [shape: f32[1,32], index: 2, kind: input, shape index: {}]   ;;  %s284_s3 = inlined_call_operand.vmem [shape: f32[16,32], index: 3, kind: input, shape index: {}]   ;;  %s285_s4 = inlined_call_operand.vmem [shape: f32[1,32], index: 4, kind: input, shape index: {}]   ;;  %s286_s5 = inlined_call_operand.vmem [shape: f32[1,32], index: 5, kind: input, shape index: {}]   ;;  %s287_s6 = inlined_call_operand.vmem [shape: f32[16,32], index: 6, kind: output, shape index: {}]  }
   0x1   :  { %v28_v0 = vld [vmem:[%s281_s1 + $0x18] sm:$0xff]  ;;  %v27_v1 = vld [vmem:[%s281_s1 + $0x10] sm:$0xff]  ;;  %v23_v2 = vld [vmem:[%s282_s0] sm:$0xff] }
   0x2   :  { %184 = vmatprep.subr.mxu0 %v28_v0  ;;  %v26_v3 = vld [vmem:[%s281_s1 + $0x8] sm:$0xff]  ;;  %192 = vmatprep.mubr.msk.f32.mxu0 %vm36_vm0, %v23_v2  ;;  %v25_v4 = vld [vmem:[%s281_s1] sm:$0xff] }
   0x3   :  { %185 = vmatpush3.msra.mxu0 %v28_v0  ;;  %v24_v5 = vld [vmem:[%s282_s0 + $0x8] sm:$0xff]  ;;  %v173_v7 = vld [vmem:[%s283_s2] ss:$0 sm:$0xff] }
   0x4   :  { %186 = vmatprep.subr.mxu0 %v27_v1  ;;  %v118_v9 = vld [vmem:[%s284_s3] sm:$0xff]  ;;  %v119_v12 = vld [vmem:[%s284_s3 + $0x8] sm:$0xff] }
   0x5   :  { %187 = vmatpush3.msra.mxu0 %v27_v1  ;;  %v176_v34 = vld [vmem:[%s285_s4] ss:$0 sm:$0xff] }
   0x6   :  { %188 = vmatprep.subr.mxu0 %v26_v3  ;;  %v177_v36 = vld [vmem:[%s286_s5] ss:$0 sm:$0xff] }
   0x7   :  { %189 = vmatpush3.msra.mxu0 %v26_v3 }
   0x8   :  { %190 = vmatprep.subr.mxu0 %v25_v4 }
   0x9   :  { %191 = vmatpush3.msra.mxu0 %v25_v4 }
   0xa   :  { %193 = vmatmul.mubr.msk.f32.vlgmr.msra.gmra.mxu0 %vm36_vm0, %v24_v5 }
  0xca   :  { %v194_v6 = vpop.f32.mrf.mxu0 }
  0xcb   :  { %v115_v10 = vadd.f32 %v194_v6, %v173_v7 }
  0xcc   :  { %v109_v8 = vpop.f32.mrf.mxu0 }
  0xcd   :  { %v110_v11 = vadd.f32 %v173_v7, %v109_v8  ;;  %v121_v15 = vadd.f32 %v119_v12, %v115_v10 }
  0xcf   :  { %v120_v13 = vadd.f32 %v118_v9, %v110_v11  ;;  %v125_v16 = vsel %vm36_vm0, %v121_v15, 0.0 }
  0xd1   :  { %v122_v14 = vsel %vm36_vm0, %v120_v13, 0.0 }
  0xd2   :  { %123 = vadd.xlane.f32.xlu0 %v122_v14 }
  0xd6   :  { %126 = vadd.xlane.f32.xlu0 %v125_v16 }
 0x15b   :  { %v124_v17 = vpop.xlane.xlu0 %123 }
 0x15c   :  { %v129_v18 = vmul.f32 0.03125, %v124_v17 }
 0x15e   :  { %v131_v19 = vsub.f32 %v120_v13, %v129_v18 }
 0x15f   :  { %v127_v20 = vpop.xlane.xlu0 %126 }
 0x160   :  { %v130_v21 = vmul.f32 0.03125, %v127_v20  ;;  %v133_v22 = vmul.f32 %v131_v19, %v131_v19 }
 0x162   :  { %v132_v23 = vsub.f32 %v121_v15, %v130_v21  ;;  %v135_v24 = vsel %vm36_vm0, %v133_v22, 0.0 }
 0x163   :  { %136 = vadd.xlane.f32.xlu1 %v135_v24 }
 0x164   :  { %v134_v25 = vmul.f32 %v132_v23, %v132_v23 }
 0x166   :  { %v138_v26 = vsel %vm36_vm0, %v134_v25, 0.0 }
 0x167   :  { %139 = vadd.xlane.f32.xlu1 %v138_v26 }
 0x1ec   :  { %v137_v27 = vpop.xlane.xlu1 %136 }
 0x1ed   :  { %v141_v28 = vmul.f32 0.03125, %v137_v27 }
 0x1ef   :  { %v143_v29 = vadd.f32 1e-05, %v141_v28 }
 0x1f0   :  { %v140_v30 = vpop.xlane.xlu1 %139 }
 0x1f1   :  { %195 = vrsqrt.f32 %v143_v29  ;;  %v142_v31 = vmul.f32 0.03125, %v140_v30 }
 0x1f3   :  { %v144_v32 = vadd.f32 1e-05, %v142_v31 }
 0x1f5   :  { %197 = vrsqrt.f32 %v144_v32 }
 0x1fe   :  { %v196_v33 = vpop.eup %195 }
 0x1ff   :  { %v147_v35 = vmul.f32 %v196_v33, %v131_v19 }
 0x201   :  { %v156_v37 = vmul.f32 %v176_v34, %v147_v35 }
 0x202   :  { %v198_v38 = vpop.eup %197 }
 0x203   :  { %v165_v39 = vadd.f32 %v177_v36, %v156_v37  ;;  %v148_v40 = vmul.f32 %v198_v38, %v132_v23 }
 0x205   :  { %167 = vst.msk [vmem:[%s287_s6] sm:$0xff] %vm36_vm0, %v165_v39  ;;  %v157_v41 = vmul.f32 %v176_v34, %v148_v40 }
 0x207   :  { %v166_v42 = vadd.f32 %v177_v36, %v157_v41 }
 0x209   :  { %168 = vst.msk [vmem:[%s287_s6 + $0x8] sm:$0xff] %vm36_vm0, %v166_v42 }

// kernel: transformer_decoder_forward.5
= control target key start
LH: loop header
LB: loop body
LE: loop exit
PB: predicated region body
PF: predicated region fallthrough
CT: control target
= control target key end

     0   :  { %s600_s21 = smov 0   ;;  %s602_s0 = smov 0   ;;  %s654_s0 = inlined_call_operand.<no memory space> [shape: s32[1], index: 0, kind: input, shape index: {}]   ;;  %s655_s1 = inlined_call_operand.vmem [shape: f32[16,32], index: 1, kind: input, shape index: {}]   ;;  %s656_s2 = inlined_call_operand.vmem [shape: f32[64,32], index: 2, kind: input, shape index: {}]   ;;  %s657_s3 = inlined_call_operand.vmem [shape: f32[32,96], index: 3, kind: input, shape index: {}]   ;;  %s658_s4 = inlined_call_operand.vmem [shape: f32[1,96], index: 4, kind: input, shape index: {}]   ;;  %s659_s5 = inlined_call_operand.vmem [shape: f32[16,32], index: 5, kind: output, shape index: {0}]   ;;  %s660_s6 = inlined_call_operand.vmem [shape: f32[16,96], index: 6, kind: output, shape index: {1}]  }
   0x1   :  { %s604_s22 = smov 0  }
   0x2 LB: > { %s30_s23 = sadd.s32 1, %s557_s0  ;;  %p489_p0 = scmp.ge.s32.totalorder %s561_s22, 1  ;;  %s561_s22 = sphi %s604_s22, %s18_s22   ;;  %s557_s0 = sphi %s602_s0, %s662_s0   ;;  %s553_s21 = sphi %s600_s21, %s661_s21  }
   0x3   : > { %p32_p1 = scmp.ge.s32.totalorder %s30_s23, 2  ;;  %p220_p2 = scmp.lt.s32.totalorder %s561_s22, 3 }
   0x5   : > { %s664_s23 = smov (%p32_p1, %s30_s23), 0  ;;  %p221_p3 = pnand %p489_p0, %p220_p2 }
   0x6   : > { %p258_p4 = scmp.lt.s32.totalorder (!%p221_p3), %s553_s21, 1 }
   0x7   : > { %224 = sbr.rel (%p221_p3) target bundleno = 217 (0xd9), region = 36 }
   0xc   : > { %v287_v0 = vld [vmem:[%s657_s3 + $0x18] sm:$0xff]  ;;  %v563_v1 = vmov 0.0   ;;  %v286_v2 = vld [vmem:[%s657_s3 + $0x10] sm:$0xff]  ;;  %vm564_vm0 = vmmov 0   ;;  %s666_s21 = smov (!%p258_p4, %s553_s21), 1  ;;  %v285_v3 = vld [vmem:[%s657_s3 + $0x8] sm:$0xff] }
   0xd   : > { %502 = vmatprep.subr.mxu0 %v563_v1  ;;  %510 = vmatprep.mubr.msk.f32.mxu0 %vm564_vm0, %v563_v1  ;;  %s490_s30 = sshll.u32 %s666_s21, 3  ;;  %v280_v4 = vld [vmem:[%s656_s2] sm:$0xff]  ;;  %vm282_vm1 = vcmask 261120   ;;  %vm368_vm2 = vcmask 785408  }
   0xe   : > { %503 = vmatpush3.msra.mxu0 %v287_v0  ;;  %v284_v5 = vld [vmem:[%s657_s3] sm:$0xff]  ;;  %s261_s13 = scalar_lea.vmem %s655_s1, %s490_s30  ;;  %s271_s16 = scalar_lea.vmem %s659_s5, %s490_s30 }
   0xf   : > { %504 = vmatprep.subr.mxu0 %v563_v1  ;;  %v279_v6 = vld [vmem:[%s261_s13] sm:$0xff]  ;;  %s277_s21 = scalar_lea.vmem %s660_s6, %s490_s30 }
  0x10   : > { %505 = vmatpush3.msra.mxu0 %v286_v2  ;;  %v281_v7 = vadd.f32 %v280_v4, %v279_v6  ;;  %v493_v8 = vld [vmem:[%s658_s4] ss:$0 sm:$0xff] }
  0x11   : > { %506 = vmatprep.subr.mxu0 %v563_v1 }
  0x12   : > { %507 = vmatpush3.msra.mxu0 %v285_v3  ;;  %283 = vst.msk [vmem:[%s271_s16] sm:$0xff] %vm282_vm1, %v281_v7 }
  0x13   : > { %508 = vmatprep.subr.mxu0 %v563_v1 }
  0x14   : > { %509 = vmatpush3.msra.mxu0 %v284_v5 }
  0x15   : > { %511 = vmatmul.mubr.msk.f32.vlgmr.msra.gmra.mxu0 %vm282_vm1, %v281_v7 }
  0xd5   : > { %v364_v9 = vpop.f32.mrf.mxu0 }
  0xd6   : > { %v365_v10 = vadd.f32 %v493_v8, %v364_v9 }
  0xd7   : > { %v512_v11 = vpop.f32.mrf.mxu0 }
  0xd8   : > { %369 = vst.msk [vmem:[%s277_s21] sm:$0xff] %vm368_vm2, %v365_v10 }
  0xd9 PF: > { %s18_s22 = sadd.s32 1, %s561_s22   ;;  %s661_s21 = smov %s557_s0 }
  0xda   : > { %p15_p5 = scmp.ge.s32.totalorder %s18_s22, 4   ;;  %s662_s0 = smov %s664_s23 }
  0xdc   :  { %17 = sbr.rel (!%p15_p5) target bundleno = 2 (0x2), region = 81 }

// kernel: transformer_decoder_forward.6
= control target key start
LH: loop header
LB: loop body
LE: loop exit
PB: predicated region body
PF: predicated region fallthrough
CT: control target
= control target key end

     0   :  { %s606_s6 = smov 0   ;;  %s647_s0 = inlined_call_operand.vmem [shape: f32[16,96], index: 0, kind: input, shape index: {}]   ;;  %s648_s1 = inlined_call_operand.vmem [shape: f32[16,32], index: 1, kind: output, shape index: {}]  }
   0x1 LB: > { %s513_s7 = sadd.s32 4294967295, %s586_s6   ;;  %p517_p0 = scmp.ge.s32.totalorder %s586_s6, 1  ;;  %s586_s6 = sphi %s606_s6, %s11_s6  }
   0x2   : > { %p86_p1 = scmp.lt.s32.totalorder %s586_s6, 3 }
   0x4   : > { %p87_p2 = pnand %p517_p0, %p86_p1 }
   0x5   : > { %p104_p3 = scmp.lt.s32.totalorder (!%p87_p2), %s513_s7, 1  ;;  %s590_s12 = smov (!%p87_p2), 96  }
   0x6   : > { %90 = sbr.rel (%p87_p2) target bundleno = 1463 (0x5b7), region = 24  ;;  %s591_s13 = smov (!%p87_p2), 64  }
   0x7   : > { %s592_s14 = smov (!%p87_p2), 80   ;;  %s593_s15 = smov (!%p87_p2), 112  }
   0x8   : > { %s594_s16 = smov (!%p87_p2), 48   ;;  %s595_s17 = smov (!%p87_p2), 16  }
   0xb   : > { %v588_v0 = vmov 0.0   ;;  %vm589_vm0 = vmmov 0   ;;  %s650_s7 = smov (!%p104_p3, %s513_s7), 1  ;;  %vm121_vm1 = vcmask 130048   ;;  %v113_v3 = vlaneseq }
   0xc   : > { %536 = vmatprep.subr.mxu0 %v588_v0  ;;  %538 = vmatprep.mubr.msk.f32.mxu0 %vm589_vm0, %v588_v0  ;;  %s518_s8 = sshll.u32 %s650_s7, 3  ;;  %vm198_vm3 = vcmask 64512   ;;  %vm458_vm4 = vcmask 261120  }
   0xd   : > { %541 = vmatprep.subr.mxu1 %v588_v0  ;;  %543 = vmatprep.mubr.msk.f32.mxu1 %vm589_vm0, %v588_v0  ;;  %s107_s11 = scalar_lea.vmem %s647_s0, %s518_s8  ;;  %v114_v4 = vshrl.u32 %v113_v3, 7  ;;  %v116_v5 = vand.u32 127, %v113_v3  ;;  %s111_s20 = scalar_lea.vmem %s648_s1, %s518_s8 }
   0xe   : > { %v112_v1 = vld [vmem:[%s107_s11] sm:$0xff] }
   0xf   : > { %119 = vrot.lane.b32.xlu0 %v112_v1, %s590_s12  ;;  %210 = vrot.lane.b32.xlu1 %v112_v1, %s591_s13  ;;  %vm117_vm2 = vcmp.le.s32.totalorder %v116_v5, %v114_v4 }
  0x13   : > { %288 = vrot.lane.b32.xlu1 %v112_v1, %s592_s14 }
  0x81   : > { %v120_v2 = vpop.permute.xlu0 %119  ;;  %v211_v11 = vpop.permute.xlu1 %210 }
  0x82   : > { %537 = vmatpush3.xpose.msk.msra.mxu0 %vm121_vm1, %v120_v2  ;;  %542 = vmatpush3.msra.mxu1 %v211_v11 }
  0x83   : > { %551 = vmatprep.subr.mxu0 %v588_v0  ;;  %546 = vmatprep.subr.mxu1 %v588_v0 }
  0x85   : > { %539 = vmatmul.mubr.msk.f32.vlgmr.msra.gmra.mxu0 %vm121_vm1, %v112_v1  ;;  %v289_v17 = vpop.permute.xlu1 %288 }
  0x86   : > { %553 = vmatprep.mubr.msk.f32.mxu0 %vm589_vm0, %v588_v0 }
 0x145   : > { %v192_v6 = vpop.f32.mrf.mxu0 }
 0x146   : > { %v196_v7 = vmul.f32 0.25, %v192_v6 }
 0x147   : > { %v540_v8 = vpop.f32.mrf.mxu0 }
 0x148   : > { %v197_v9 = vsel %vm117_vm2, %v196_v7, -1e+30 }
 0x149   : > { %v199_v10 = vsel %vm198_vm3, %v197_v9, -inf }
 0x14a   : > { %200 = vmax.xlane.f32.xlu0 %v199_v10 }
 0x1d3   : > { %v201_v12 = vpop.xlane.xlu0 %200 }
 0x1d4   : > { %v202_v13 = vsub.f32 %v197_v9, %v201_v12 }
 0x1d6   : > { %v203_v14 = vmul.f32 1.442695, %v202_v13 }
 0x1d8   : > { %572 = vpow2.f32 %v203_v14 }
 0x1e5   : > { %v573_v15 = vpop.eup %572 }
 0x1e6   : > { %v205_v16 = vsel %vm198_vm3, %v573_v15, 0.0 }
 0x1e7   : > { %206 = vadd.xlane.f32.xlu1 %v205_v16 }
 0x1f8   : > { %286 = vrot.lane.b32.xlu1 %v112_v1, %s593_s15 }
 0x270   : > { %v207_v18 = vpop.xlane.xlu1 %206 }
 0x271   : > { %574 = vrcp.f32 %v207_v18 }
 0x274   : > { %v287_v21 = vpop.permute.xlu1 %286 }
 0x27e   : > { %v575_v19 = vpop.eup %574 }
 0x27f   : > { %v209_v20 = vmul.f32 %v575_v19, %v573_v15 }
 0x281   : > { %544 = vmatmul.mubr.msk.f32.vlgmr.msra.gmra.mxu1 %vm198_vm3, %v209_v20 }
 0x282   : > { %547 = vmatpush3.xpose.msk.msra.mxu1 %vm121_vm1, %v289_v17  ;;  %548 = vmatprep.mubr.msk.f32.mxu1 %vm589_vm0, %v588_v0 }
 0x285   : > { %549 = vmatmul.mubr.msk.f32.vlgmr.msra.gmra.mxu1 %vm121_vm1, %v287_v21 }
 0x341   : > { %v282_v22 = vpop.f32.mrf.mxu1 }
 0x343   : > { %v545_v23 = vpop.f32.mrf.mxu1 }
 0x345   : > { %v360_v24 = vpop.f32.mrf.mxu1 }
 0x346   : > { %v364_v25 = vmul.f32 0.25, %v360_v24 }
 0x347   : > { %v550_v26 = vpop.f32.mrf.mxu1 }
 0x348   : > { %v365_v27 = vsel %vm117_vm2, %v364_v25, -1e+30 }
 0x349   : > { %v366_v28 = vsel %vm198_vm3, %v365_v27, -inf }
 0x34a   : > { %367 = vmax.xlane.f32.xlu1 %v366_v28 }
 0x3d3   : > { %v368_v29 = vpop.xlane.xlu1 %367 }
 0x3d4   : > { %v369_v30 = vsub.f32 %v365_v27, %v368_v29 }
 0x3d6   : > { %v370_v31 = vmul.f32 1.442695, %v369_v30 }
 0x3d8   : > { %576 = vpow2.f32 %v370_v31 }
 0x3e5   : > { %v577_v32 = vpop.eup %576 }
 0x3e6   : > { %v372_v33 = vsel %vm198_vm3, %v577_v32, 0.0 }
 0x3e7   : > { %373 = vadd.xlane.f32.xlu0 %v372_v33 }
 0x3fd   : > { %377 = vrot.lane.b32.xlu0 %v112_v1, %s594_s16 }
 0x470   : > { %v374_v34 = vpop.xlane.xlu0 %373 }
 0x471   : > { %578 = vrcp.f32 %v374_v34 }
 0x474   : > { %v378_v35 = vpop.permute.xlu0 %377 }
 0x475   : > { %552 = vmatpush3.msra.mxu0 %v378_v35 }
 0x47e   : > { %v579_v36 = vpop.eup %578 }
 0x47f   : > { %v376_v37 = vmul.f32 %v579_v36, %v577_v32 }
 0x481   : > { %554 = vmatmul.mubr.msk.f32.vlgmr.msra.gmra.mxu0 %vm198_vm3, %v376_v37 }
 0x541   : > { %v449_v38 = vpop.f32.mrf.mxu0 }
 0x542   : > { %454 = vrot.lane.b32.xlu0 %v449_v38, %s595_s17 }
 0x543   : > { %v555_v39 = vpop.f32.mrf.mxu0 }
 0x5b4   : > { %v455_v40 = vpop.permute.xlu0 %454 }
 0x5b5   : > { %v457_v41 = vsel %vm121_vm1, %v282_v22, %v455_v40 }
 0x5b6   : > { %459 = vst.msk [vmem:[%s111_s20] sm:$0xff] %vm458_vm4, %v457_v41 }
 0x5b7 PF: > { %s11_s6 = sadd.s32 1, %s586_s6  }
 0x5b8   : > { %p8_p4 = scmp.ge.s32.totalorder %s11_s6, 4  }
 0x5ba   :  { %10 = sbr.rel (!%p8_p4) target bundleno = 1 (0x1), region = 54 }

// kernel: transformer_decoder_forward.8
= control target key start
LH: loop header
LB: loop body
LE: loop exit
PB: predicated region body
PF: predicated region fallthrough
CT: control target
= control target key end

     0   :  { %vm30_vm0 = vcmask 261120   ;;  %v352_v14 = vmov 0.0   ;;  %vm140_vm1 = vcmask 523264   ;;  %s469_s1 = inlined_call_operand.vmem [shape: f32[32,64], index: 1, kind: input, shape index: {}]   ;;  %s470_s0 = inlined_call_operand.vmem [shape: f32[16,32], index: 0, kind: input, shape index: {}]   ;;  %s471_s3 = inlined_call_operand.vmem [shape: f32[64,32], index: 3, kind: input, shape index: {}]   ;;  %s472_s2 = inlined_call_operand.vmem [shape: f32[1,64], index: 2, kind: input, shape index: {}]   ;;  %s473_s4 = inlined_call_operand.vmem [shape: f32[1,32], index: 4, kind: input, shape index: {}]   ;;  %s474_s5 = inlined_call_operand.vmem [shape: f32[1,32], index: 5, kind: input, shape index: {}]   ;;  %s475_s6 = inlined_call_operand.vmem [shape: f32[1,32], index: 6, kind: input, shape index: {}]   ;;  %s476_s7 = inlined_call_operand.vmem [shape: f32[16,32], index: 7, kind: output, shape index: {}]  }
   0x1   :  { %v38_v0 = vld [vmem:[%s469_s1 + $0x18] sm:$0xff]  ;;  %v37_v1 = vld [vmem:[%s469_s1 + $0x10] sm:$0xff]  ;;  %v402_v2 = vld [vmem:[%s470_s0] sm:$0xff]  ;;  %32 = vst.msk [vmem:[#allocation2 + $0x8] sm:$0xff] %vm30_vm0, %v352_v14 }
   0x2   :  { %317 = vmatprep.subr.mxu0 %v38_v0  ;;  %v36_v3 = vld [vmem:[%s469_s1 + $0x8] sm:$0xff]  ;;  %325 = vmatprep.mubr.msk.f32.mxu0 %vm30_vm0, %v402_v2  ;;  %v139_v4 = vld [vmem:[%s471_s3 + $0x38] sm:$0xff]  ;;  %v138_v5 = vld [vmem:[%s471_s3 + $0x30] sm:$0xff]  ;;  %31 = vst.msk [vmem:[#allocation2] sm:$0xff] %vm30_vm0, %v352_v14 }
   0x3   :  { %318 = vmatpush3.msra.mxu0 %v38_v0  ;;  %328 = vmatprep.subr.mxu1 %v139_v4  ;;  %v35_v6 = vld [vmem:[%s469_s1] sm:$0xff]  ;;  %v137_v7 = vld [vmem:[%s471_s3 + $0x28] sm:$0xff]  ;;  %v135_v10 = vld [vmem:[%s471_s3 + $0x18] sm:$0xff] }
   0x4   :  { %319 = vmatprep.subr.mxu0 %v37_v1  ;;  %329 = vmatpush3.msra.mxu1 %v139_v4  ;;  %v34_v8 = vld [vmem:[%s470_s0 + $0x8] sm:$0xff]  ;;  %v136_v9 = vld [vmem:[%s471_s3 + $0x20] sm:$0xff]  ;;  %v134_v11 = vld [vmem:[%s471_s3 + $0x10] sm:$0xff] }
   0x5   :  { %320 = vmatpush3.msra.mxu0 %v37_v1  ;;  %330 = vmatprep.subr.mxu1 %v138_v5  ;;  %v133_v12 = vld [vmem:[%s471_s3 + $0x8] sm:$0xff]  ;;  %v132_v13 = vld [vmem:[%s471_s3] sm:$0xff] }
   0x6   :  { %321 = vmatprep.subr.mxu0 %v36_v3  ;;  %331 = vmatpush3.msra.mxu1 %v138_v5  ;;  %v293_v15 = vld [vmem:[%s472_s2] ss:$0 sm:$0xff] }
   0x7   :  { %322 = vmatpush3.msra.mxu0 %v36_v3  ;;  %332 = vmatprep.subr.mxu1 %v137_v7  ;;  %v298_v28 = vld [vmem:[%s473_s4] ss:$0 sm:$0xff] }
   0x8   :  { %323 = vmatprep.subr.mxu0 %v35_v6  ;;  %333 = vmatpush3.msra.mxu1 %v137_v7  ;;  %v131_v22 = vld [vmem:[#allocation2 + $0x8] sm:$0xff]  ;;  %v299_v54 = vld [vmem:[%s474_s5] ss:$0 sm:$0xff] }
   0x9   :  { %324 = vmatpush3.msra.mxu0 %v35_v6  ;;  %334 = vmatprep.subr.mxu1 %v136_v9  ;;  %v130_v24 = vld [vmem:[#allocation2] sm:$0xff] }
   0xa   :  { %326 = vmatmul.mubr.msk.f32.vlgmr.msra.gmra.mxu0 %vm30_vm0, %v34_v8  ;;  %335 = vmatpush3.msra.mxu1 %v136_v9  ;;  %v300_v56 = vld [vmem:[%s475_s6] ss:$0 sm:$0xff] }
   0xb   :  { %336 = vmatprep.subr.mxu1 %v135_v10 }
   0xc   :  { %337 = vmatpush3.msra.mxu1 %v135_v10 }
   0xd   :  { %338 = vmatprep.subr.mxu1 %v134_v11 }
   0xe   :  { %339 = vmatpush3.msra.mxu1 %v134_v11 }
   0xf   :  { %340 = vmatprep.subr.mxu1 %v133_v12 }
  0x10   :  { %341 = vmatpush3.msra.mxu1 %v133_v12 }
  0x11   :  { %342 = vmatprep.subr.mxu1 %v132_v13 }
  0x12   :  { %343 = vmatpush3.msra.mxu1 %v132_v13 }
  0xca   :  { %v327_v16 = vpop.f32.mrf.mxu0 }
  0xcb   :  { %v125_v17 = vadd.f32 %v327_v16, %v293_v15 }
  0xcc   :  { %v119_v18 = vpop.f32.mrf.mxu0 }
  0xcd   :  { %v120_v19 = vadd.f32 %v293_v15, %v119_v18  ;;  %v129_v21 = vmax.f32 %v125_v17, 0.0 }
  0xcf   :  { %v128_v20 = vmax.f32 %v120_v19, 0.0 }
  0xd1   :  { %344 = vmatprep.mubr.msk.f32.mxu1 %vm140_vm1, %v128_v20 }
  0xd2   :  { %345 = vmatmul.mubr.msk.f32.vlgmr.msra.gmra.mxu1 %vm140_vm1, %v129_v21 }
 0x192   :  { %v346_v23 = vpop.f32.mrf.mxu1 }
 0x193   :  { %v223_v25 = vadd.f32 %v346_v23, %v131_v22 }
 0x194   :  { %v213_v26 = vpop.f32.mrf.mxu1 }
 0x195   :  { %225 = vst.msk [vmem:[#allocation2 + $0x8] sm:$0xff] %vm30_vm0, %v223_v25  ;;  %v222_v27 = vadd.f32 %v213_v26, %v130_v24 }
 0x197   :  { %224 = vst.msk [vmem:[#allocation2] sm:$0xff] %vm30_vm0, %v222_v27 }
 0x19c   :  { %v230_v29 = vld [vmem:[#allocation2 + $0x8] sm:$0xff] }
 0x19d   :  { %v239_v32 = vadd.f32 %v298_v28, %v230_v29 }
 0x19e   :  { %v229_v30 = vld [vmem:[#allocation2] sm:$0xff] }
 0x19f   :  { %v238_v31 = vadd.f32 %v298_v28, %v229_v30  ;;  %v241_v35 = vadd.f32 %v239_v32, %v34_v8 }
 0x1a1   :  { %v240_v33 = vadd.f32 %v238_v31, %v402_v2  ;;  %v245_v36 = vsel %vm30_vm0, %v241_v35, 0.0 }
 0x1a3   :  { %v242_v34 = vsel %vm30_vm0, %v240_v33, 0.0 }
 0x1a4   :  { %243 = vadd.xlane.f32.xlu0 %v242_v34 }
 0x1a8   :  { %246 = vadd.xlane.f32.xlu0 %v245_v36 }
 0x22d   :  { %v244_v37 = vpop.xlane.xlu0 %243 }
 0x22e   :  { %v249_v38 = vmul.f32 0.03125, %v244_v37 }
 0x230   :  { %v251_v39 = vsub.f32 %v240_v33, %v249_v38 }
 0x231   :  { %v247_v40 = vpop.xlane.xlu0 %246 }
 0x232   :  { %v250_v41 = vmul.f32 0.03125, %v247_v40  ;;  %v253_v42 = vmul.f32 %v251_v39, %v251_v39 }
 0x234   :  { %v252_v43 = vsub.f32 %v241_v35, %v250_v41  ;;  %v255_v44 = vsel %vm30_vm0, %v253_v42, 0.0 }
 0x235   :  { %256 = vadd.xlane.f32.xlu1 %v255_v44 }
 0x236   :  { %v254_v45 = vmul.f32 %v252_v43, %v252_v43 }
 0x238   :  { %v258_v46 = vsel %vm30_vm0, %v254_v45, 0.0 }
 0x239   :  { %259 = vadd.xlane.f32.xlu1 %v258_v46 }
 0x2be   :  { %v257_v47 = vpop.xlane.xlu1 %256 }
 0x2bf   :  { %v261_v48 = vmul.f32 0.03125, %v257_v47 }
 0x2c1   :  { %v263_v49 = vadd.f32 1e-05, %v261_v48 }
 0x2c2   :  { %v260_v50 = vpop.xlane.xlu1 %259 }
 0x2c3   :  { %348 = vrsqrt.f32 %v263_v49  ;;  %v262_v51 = vmul.f32 0.03125, %v260_v50 }
 0x2c5   :  { %v264_v52 = vadd.f32 1e-05, %v262_v51 }
 0x2c7   :  { %350 = vrsqrt.f32 %v264_v52 }
 0x2d0   :  { %v349_v53 = vpop.eup %348 }
 0x2d1   :  { %v267_v55 = vmul.f32 %v349_v53, %v251_v39 }
 0x2d3   :  { %v276_v57 = vmul.f32 %v299_v54, %v267_v55 }
 0x2d4   :  { %v351_v58 = vpop.eup %350 }
 0x2d5   :  { %v285_v59 = vadd.f32 %v300_v56, %v276_v57  ;;  %v268_v60 = vmul.f32 %v351_v58, %v252_v43 }
 0x2d7   :  { %287 = vst.msk [vmem:[%s476_s7] sm:$0xff] %vm30_vm0, %v285_v59  ;;  %v277_v61 = vmul.f32 %v299_v54, %v268_v60 }
 0x2d9   :  { %v286_v62 = vadd.f32 %v300_v56, %v277_v61 }
 0x2db   :  { %288 = vst.msk [vmem:[%s476_s7 + $0x8] sm:$0xff] %vm30_vm0, %v286_v62 }

// kernel: transformer_decoder_forward.9
= control target key start
LH: loop header
LB: loop body
LE: loop exit
PB: predicated region body
PF: predicated region fallthrough
CT: control target
= control target key end

     0   :  { %vm27_vm0 = vcmask 261120   ;;  %vm109_vm1 = vcmask 408576   ;;  %s225_s1 = inlined_call_operand.vmem [shape: f32[32,50], index: 1, kind: input, shape index: {}]   ;;  %s226_s0 = inlined_call_operand.vmem [shape: f32[16,32], index: 0, kind: input, shape index: {}]   ;;  %s227_s2 = inlined_call_operand.vmem [shape: f32[1,50], index: 2, kind: input, shape index: {}]   ;;  %s228_s3 = inlined_call_operand.vmem [shape: f32[16,50], index: 3, kind: output, shape index: {}]  }
   0x1   :  { %v19_v0 = vld [vmem:[%s225_s1 + $0x18] sm:$0xff]  ;;  %v18_v1 = vld [vmem:[%s225_s1 + $0x10] sm:$0xff]  ;;  %v14_v2 = vld [vmem:[%s226_s0] sm:$0xff] }
   0x2   :  { %151 = vmatprep.subr.mxu0 %v19_v0  ;;  %v17_v3 = vld [vmem:[%s225_s1 + $0x8] sm:$0xff]  ;;  %159 = vmatprep.mubr.msk.f32.mxu0 %vm27_vm0, %v14_v2  ;;  %v16_v4 = vld [vmem:[%s225_s1] sm:$0xff] }
   0x3   :  { %152 = vmatpush3.msra.mxu0 %v19_v0  ;;  %v15_v5 = vld [vmem:[%s226_s0 + $0x8] sm:$0xff]  ;;  %v142_v7 = vld [vmem:[%s227_s2] ss:$0 sm:$0xff] }
   0x4   :  { %153 = vmatprep.subr.mxu0 %v18_v1 }
   0x5   :  { %154 = vmatpush3.msra.mxu0 %v18_v1 }
   0x6   :  { %155 = vmatprep.subr.mxu0 %v17_v3 }
   0x7   :  { %156 = vmatpush3.msra.mxu0 %v17_v3 }
   0x8   :  { %157 = vmatprep.subr.mxu0 %v16_v4 }
   0x9   :  { %158 = vmatpush3.msra.mxu0 %v16_v4 }
   0xa   :  { %160 = vmatmul.mubr.msk.f32.vlgmr.msra.gmra.mxu0 %vm27_vm0, %v15_v5 }
  0xca   :  { %v161_v6 = vpop.f32.mrf.mxu0 }
  0xcb   :  { %v106_v10 = vadd.f32 %v161_v6, %v142_v7 }
  0xcc   :  { %v100_v8 = vpop.f32.mrf.mxu0 }
  0xcd   :  { %v101_v9 = vadd.f32 %v142_v7, %v100_v8  ;;  %v113_v12 = vsel %vm109_vm1, %v106_v10, -inf }
  0xcf   :  { %v110_v11 = vsel %vm109_vm1, %v101_v9, -inf }
  0xd0   :  { %111 = vmax.xlane.f32.xlu0 %v110_v11 }
  0xd4   :  { %114 = vmax.xlane.f32.xlu0 %v113_v12 }
 0x159   :  { %v112_v13 = vpop.xlane.xlu0 %111 }
 0x15a   :  { %v116_v14 = vsub.f32 %v101_v9, %v112_v13 }
 0x15c   :  { %v118_v15 = vmul.f32 1.442695, %v116_v14 }
 0x15d   :  { %v115_v16 = vpop.xlane.xlu0 %114 }
 0x15e   :  { %162 = vpow2.f32 %v118_v15  ;;  %v117_v17 = vsub.f32 %v106_v10, %v115_v16 }
 0x160   :  { %v120_v18 = vmul.f32 1.442695, %v117_v17 }
 0x162   :  { %164 = vpow2.f32 %v120_v18 }
 0x16b   :  { %v163_v19 = vpop.eup %162 }
 0x16c   :  { %v122_v20 = vsel %vm109_vm1, %v163_v19, 0.0 }
 0x16d   :  { %123 = vadd.xlane.f32.xlu1 %v122_v20 }
 0x16f   :  { %v165_v21 = vpop.eup %164 }
 0x170   :  { %v125_v22 = vsel %vm109_vm1, %v165_v21, 0.0 }
 0x171   :  { %126 = vadd.xlane.f32.xlu1 %v125_v22 }
 0x1f6   :  { %v124_v23 = vpop.xlane.xlu1 %123 }
 0x1f7   :  { %166 = vlog2.f32 %v124_v23 }
 0x1fa   :  { %v127_v24 = vpop.xlane.xlu1 %126 }
 0x1fb   :  { %168 = vlog2.f32 %v127_v24 }
 0x204   :  { %v167_v25 = vpop.eup %166 }
 0x205   :  { %v129_v26 = vmul.f32 0.6931472, %v167_v25 }
 0x207   :  { %v132_v27 = vadd.f32 %v129_v26, %v112_v13 }
 0x208   :  { %v169_v28 = vpop.eup %168 }
 0x209   :  { %v134_v29 = vsub.f32 %v101_v9, %v132_v27  ;;  %v131_v30 = vmul.f32 0.6931472, %v169_v28 }
 0x20b   :  { %136 = vst.msk [vmem:[%s228_s3] sm:$0xff] %vm109_vm1, %v134_v29  ;;  %v133_v31 = vadd.f32 %v131_v30, %v115_v16 }
 0x20d   :  { %v135_v32 = vsub.f32 %v106_v10, %v133_v31 }
 0x20f   :  { %137 = vst.msk [vmem:[%s228_s3 + $0x8] sm:$0xff] %vm109_vm1, %v135_v32 }

</bundles_post_ra>
